<compile_context>
chip_gen: v7x
topology: tpu7x:2x2x1
jax: 0.10.0
libtpu: 0.0.40
codegen_flags: <defaults>
</compile_context>

<pallas_src>
import jax
import jax.numpy as jnp
from jax import lax
from jax.experimental import pallas as pl
from jax.experimental.pallas import tpu as pltpu

EPS = 1e-5


def down_kernel(xp_ref, w1_ref, s1_ref, b1_ref, w2_ref, s2_ref, b2_ref, out_ref):
    Hp = xp_ref.shape[1]
    Wp = xp_ref.shape[3]
    cin = xp_ref.shape[4] // 2
    cmid = w1_ref.shape[1]

    # ---- 2x2 max pool -----------------------------------------------------------
    # Window positions were exposed by a free reshape in the wrapper:
    # axis 2 = row offset (0/1), lane halves = column offset (0/1).
    x = xp_ref[0]                                             # (Hp, 2, Wp, 2*Cin)
    xh = jnp.maximum(x[:, 0], x[:, 1])                        # (Hp, Wp, 2*Cin)
    pooled = jnp.maximum(xh[:, :, :cin], xh[:, :, cin:])      # (Hp, Wp, Cin)

    def im2col(feat):
        """(Hp, Wp, C) f32 -> (Hp*Wp, 9*C) bf16; tap/column order is (dy, dx, c)."""
        c = feat.shape[-1]
        zr = jnp.zeros((1, Wp, c), feat.dtype)
        f = jnp.concatenate([zr, feat, zr], axis=0)           # (Hp+2, Wp, C)
        zc = jnp.zeros((Hp + 2, 1, c), feat.dtype)
        f = jnp.concatenate([zc, f, zc], axis=1)              # (Hp+2, Wp+2, C), zero halo
        taps = [f[dy:dy + Hp, dx:dx + Wp, :]
                for dy in range(3) for dx in range(3)]
        t = jnp.concatenate(taps, axis=-1)                    # (Hp, Wp, 9*C)
        return t.reshape(Hp * Wp, 9 * c).astype(jnp.bfloat16)

    # ---- conv1: single im2col matmul; folded BN (eval) + ReLU in f32 -------------
    t1 = im2col(pooled)                                       # (HW, 9*Cin) bf16
    y1 = jnp.dot(t1, w1_ref[...], preferred_element_type=jnp.float32)   # (HW, Cmid)
    y1 = jnp.maximum(y1 * s1_ref[...] + b1_ref[...], 0.0)

    # ---- conv2: NT matmul so the result is (Cout, HW) -> lane-dense, NCHW output -
    t2 = im2col(y1.reshape(Hp, Wp, cmid))                     # (HW, 9*Cmid) bf16
    y2 = lax.dot_general(w2_ref[...], t2,
                         dimension_numbers=(((1,), (1,)), ((), ())),
                         preferred_element_type=jnp.float32)  # (Cout, HW)
    y2 = jnp.maximum(y2 * s2_ref[...] + b2_ref[...], 0.0)
    out_ref[0] = y2


def down_forward(x_nhwc, w1, s1, b1, w2t, s2t, b2t):
    N, H, W, Cin = x_nhwc.shape
    Hp, Wp = H // 2, W // 2
    Cmid = w1.shape[1]
    Cout = w2t.shape[0]

    # Free (row-major, metadata-only) reshape exposing the 2x2 pooling window:
    # (N, H, W, C) -> (N, Hp, 2, Wp, 2*C).  No transpose, no extra HBM pass.
    xp = x_nhwc.reshape(N, Hp, 2, Wp, 2 * Cin)

    grid_spec = pltpu.PrefetchScalarGridSpec(
        num_scalar_prefetch=0,
        grid=(N,),
        in_specs=[
            pl.BlockSpec((1, Hp, 2, Wp, 2 * Cin), lambda n: (n, 0, 0, 0, 0)),
            pl.BlockSpec((9 * Cin, Cmid), lambda n: (0, 0)),
            pl.BlockSpec((1, Cmid), lambda n: (0, 0)),
            pl.BlockSpec((1, Cmid), lambda n: (0, 0)),
            pl.BlockSpec((Cout, 9 * Cmid), lambda n: (0, 0)),
            pl.BlockSpec((Cout, 1), lambda n: (0, 0)),
            pl.BlockSpec((Cout, 1), lambda n: (0, 0)),
        ],
        out_specs=pl.BlockSpec((1, Cout, Hp * Wp), lambda n: (n, 0, 0)),
    )
    out = pl.pallas_call(
        down_kernel,
        out_shape=jax.ShapeDtypeStruct((N, Cout, Hp * Wp), jnp.float32),
        grid_spec=grid_spec,
        compiler_params=pltpu.CompilerParams(
            dimension_semantics=("parallel",),   # one batch element per TensorCore on v7x
            vmem_limit_bytes=32 * 1024 * 1024),
    )(xp, w1, s1, b1, w2t, s2t, b2t)
    # Free reshape: (N, Cout, Hp*Wp) -> NCHW (N, Cout, Hp, Wp).
    return out.reshape(N, Cout, Hp, Wp)


# ---------------- parameter construction (deterministic, synthetic) ----------------

def init_conv_bn(key, cin, cout):
    ks = jax.random.split(key, 6)
    w = 0.2 * jax.random.normal(ks[0], (cout, cin, 3, 3), jnp.float32)      # OIHW
    b = 0.1 * jax.random.normal(ks[1], (cout,), jnp.float32)
    gamma = 1.0 + 0.1 * jax.random.normal(ks[2], (cout,), jnp.float32)
    beta = 0.1 * jax.random.normal(ks[3], (cout,), jnp.float32)
    mean = 0.1 * jax.random.normal(ks[4], (cout,), jnp.float32)
    var = 0.5 + jnp.abs(jax.random.normal(ks[5], (cout,), jnp.float32))
    return dict(w=w, b=b, gamma=gamma, beta=beta, mean=mean, var=var)


def fold_conv_bn_first(p):
    """Conv1 weights as (9*I, O) bf16 (rows ordered dy, dx, c), folded BN as (1, O)."""
    scale = p["gamma"] / jnp.sqrt(p["var"] + EPS)
    bias = (p["b"] - p["mean"]) * scale + p["beta"]
    o, i = p["w"].shape[0], p["w"].shape[1]
    w = jnp.transpose(p["w"], (2, 3, 1, 0)).reshape(9 * i, o)
    return w.astype(jnp.bfloat16), scale.reshape(1, -1), bias.reshape(1, -1)


def fold_conv_bn_second(p):
    """Conv2 weights as (O, 9*I) bf16 (cols ordered dy, dx, c), folded BN as (O, 1)."""
    scale = p["gamma"] / jnp.sqrt(p["var"] + EPS)
    bias = (p["b"] - p["mean"]) * scale + p["beta"]
    o, i = p["w"].shape[0], p["w"].shape[1]
    w = jnp.transpose(p["w"], (0, 2, 3, 1)).reshape(o, 9 * i)
    return w.astype(jnp.bfloat16), scale.reshape(-1, 1), bias.reshape(-1, 1)


# ---------------- pure-JAX reference (NCHW, mirrors the PyTorch module) ----------------

def ref_block(x, p, mxu_dtype=None):
    w = p["w"]
    if mxu_dtype is not None:   # optionally mirror the kernel's bf16 MXU operand rounding
        x = x.astype(mxu_dtype).astype(jnp.float32)
        w = w.astype(mxu_dtype).astype(jnp.float32)
    y = lax.conv_general_dilated(
        x, w, window_strides=(1, 1), padding=((1, 1), (1, 1)),
        dimension_numbers=("NCHW", "OIHW", "NCHW"),
        precision=lax.Precision.HIGHEST)
    y = y + p["b"][None, :, None, None]
    y = (y - p["mean"][None, :, None, None]) / jnp.sqrt(p["var"] + EPS)[None, :, None, None]
    y = y * p["gamma"][None, :, None, None] + p["beta"][None, :, None, None]
    return jnp.maximum(y, 0.0)


def ref_down(x_nchw, p1, p2, mxu_dtype=None):
    N, C, H, W = x_nchw.shape
    x = x_nchw.reshape(N, C, H // 2, 2, W // 2, 2).max(axis=(3, 5))  # MaxPool2d(2)
    return ref_block(ref_block(x, p1, mxu_dtype), p2, mxu_dtype)


if __name__ == "__main__":
    key = jax.random.PRNGKey(0)
    kx, k1, k2 = jax.random.split(key, 3)

    N, Cin, H, W = 2, 4, 16, 16
    Cout = 8  # Down(4, 8): DoubleConv(4, 8) => conv1: 4->8, conv2: 8->8

    x_nchw = jax.random.normal(kx, (N, Cin, H, W), jnp.float32)   # PyTorch NCHW input
    x_nhwc = jnp.transpose(x_nchw, (0, 2, 3, 1))                  # kernel's TPU layout

    p1 = init_conv_bn(k1, Cin, Cout)
    p2 = init_conv_bn(k2, Cout, Cout)
    w1, s1, b1 = fold_conv_bn_first(p1)
    w2t, s2t, b2t = fold_conv_bn_second(p2)

    out = down_forward(x_nhwc, w1, s1, b1, w2t, s2t, b2t)         # (N, Cout, Hp, Wp) NCHW
    out = jax.block_until_ready(out)

    # Tight structural check: reference uses the same bf16 operand rounding as the MXU
    # (f32 accumulation); residual is accumulation-order / re-quantization noise only.
    ref_b = ref_down(x_nchw, p1, p2, mxu_dtype=jnp.bfloat16)
    err_b = float(jnp.max(jnp.abs(out - ref_b)))
    assert err_b < 2e-2, f"mismatch vs bf16-operand reference, max abs err = {err_b}"

    # Sanity bound vs full-f32 module semantics (difference = bf16 MXU operand rounding).
    ref_f = ref_down(x_nchw, p1, p2, mxu_dtype=None)
    err_f = float(jnp.max(jnp.abs(out - ref_f)))
    assert err_f < 1.5e-1, f"mismatch vs f32 reference, max abs err = {err_f}"

    print("KERNEL_OK")
</pallas_src>

<mosaic_0001>
module attributes {stable_mosaic.version = 11 : i64} {
  func.func @down_kernel(%arg0: i32, %arg1: memref<1x8x2x8x8xf32, #tpu.memory_space<vmem>>, %arg2: memref<36x8xbf16, #tpu.memory_space<vmem>>, %arg3: memref<1x8xf32, #tpu.memory_space<vmem>>, %arg4: memref<1x8xf32, #tpu.memory_space<vmem>>, %arg5: memref<8x72xbf16, #tpu.memory_space<vmem>>, %arg6: memref<8x1xf32, #tpu.memory_space<vmem>>, %arg7: memref<8x1xf32, #tpu.memory_space<vmem>>, %arg8: memref<1x8x64xf32, #tpu.memory_space<vmem>>) attributes {dimension_semantics = [#tpu.dimension_semantics<parallel>], iteration_bounds = array<i64: 2>, scalar_prefetch = 0 : i64, scratch_operands = 0 : i64, tpu.core_type = #tpu.core_type<tc>, window_params = [{transform_indices = @transform_0, window_bounds = array<i64: 1, 8, 2, 8, 8>}, {pipeline_mode = #tpu.pipeline_mode<synchronous>, transform_indices = @transform_1, window_bounds = array<i64: 36, 8>}, {pipeline_mode = #tpu.pipeline_mode<synchronous>, transform_indices = @transform_2, window_bounds = array<i64: 1, 8>}, {pipeline_mode = #tpu.pipeline_mode<synchronous>, transform_indices = @transform_3, window_bounds = array<i64: 1, 8>}, {pipeline_mode = #tpu.pipeline_mode<synchronous>, transform_indices = @transform_4, window_bounds = array<i64: 8, 72>}, {pipeline_mode = #tpu.pipeline_mode<synchronous>, transform_indices = @transform_5, window_bounds = array<i64: 8, 1>}, {pipeline_mode = #tpu.pipeline_mode<synchronous>, transform_indices = @transform_6, window_bounds = array<i64: 8, 1>}, {transform_indices = @transform_7, window_bounds = array<i64: 1, 8, 64>}]} {
    %c0 = arith.constant 0 : index
    %c0_0 = arith.constant 0 : index
    %c0_1 = arith.constant 0 : index
    %c0_2 = arith.constant 0 : index
    %c0_3 = arith.constant 0 : index
    %0 = vector.load %arg1[%c0, %c0_0, %c0_1, %c0_2, %c0_3] : memref<1x8x2x8x8xf32, #tpu.memory_space<vmem>>, vector<1x8x2x8x8xf32>
    %1 = vector.shape_cast %0 : vector<1x8x2x8x8xf32> to vector<8x2x8x8xf32>
    %2 = vector.extract_strided_slice %1 {offsets = [0, 0, 0, 0], sizes = [8, 1, 8, 8], strides = [1, 1, 1, 1]} : vector<8x2x8x8xf32> to vector<8x1x8x8xf32>
    %3 = vector.shape_cast %2 : vector<8x1x8x8xf32> to vector<8x8x8xf32>
    %4 = vector.extract_strided_slice %1 {offsets = [0, 1, 0, 0], sizes = [8, 1, 8, 8], strides = [1, 1, 1, 1]} : vector<8x2x8x8xf32> to vector<8x1x8x8xf32>
    %5 = vector.shape_cast %4 : vector<8x1x8x8xf32> to vector<8x8x8xf32>
    %6 = arith.maximumf %3, %5 : vector<8x8x8xf32>
    %7 = vector.extract_strided_slice %6 {offsets = [0, 0, 0], sizes = [8, 8, 4], strides = [1, 1, 1]} : vector<8x8x8xf32> to vector<8x8x4xf32>
    %8 = vector.extract_strided_slice %6 {offsets = [0, 0, 4], sizes = [8, 8, 4], strides = [1, 1, 1]} : vector<8x8x8xf32> to vector<8x8x4xf32>
    %9 = arith.maximumf %7, %8 : vector<8x8x4xf32>
    %cst = arith.constant 0.000000e+00 : f32
    %10 = vector.broadcast %cst : f32 to vector<1x8x4xf32>
    %11 = tpu.concatenate %10, %9, %10 in 0 : vector<1x8x4xf32>, vector<8x8x4xf32>, vector<1x8x4xf32> -> vector<10x8x4xf32>
    %cst_4 = arith.constant 0.000000e+00 : f32
    %12 = vector.broadcast %cst_4 : f32 to vector<10x1x4xf32>
    %13 = tpu.concatenate %12, %11, %12 in 1 : vector<10x1x4xf32>, vector<10x8x4xf32>, vector<10x1x4xf32> -> vector<10x10x4xf32>
    %14 = vector.extract_strided_slice %13 {offsets = [0, 0, 0], sizes = [8, 8, 4], strides = [1, 1, 1]} : vector<10x10x4xf32> to vector<8x8x4xf32>
    %15 = vector.extract_strided_slice %13 {offsets = [0, 1, 0], sizes = [8, 8, 4], strides = [1, 1, 1]} : vector<10x10x4xf32> to vector<8x8x4xf32>
    %16 = vector.extract_strided_slice %13 {offsets = [0, 2, 0], sizes = [8, 8, 4], strides = [1, 1, 1]} : vector<10x10x4xf32> to vector<8x8x4xf32>
    %17 = vector.extract_strided_slice %13 {offsets = [1, 0, 0], sizes = [8, 8, 4], strides = [1, 1, 1]} : vector<10x10x4xf32> to vector<8x8x4xf32>
    %18 = vector.extract_strided_slice %13 {offsets = [1, 1, 0], sizes = [8, 8, 4], strides = [1, 1, 1]} : vector<10x10x4xf32> to vector<8x8x4xf32>
    %19 = vector.extract_strided_slice %13 {offsets = [1, 2, 0], sizes = [8, 8, 4], strides = [1, 1, 1]} : vector<10x10x4xf32> to vector<8x8x4xf32>
    %20 = vector.extract_strided_slice %13 {offsets = [2, 0, 0], sizes = [8, 8, 4], strides = [1, 1, 1]} : vector<10x10x4xf32> to vector<8x8x4xf32>
    %21 = vector.extract_strided_slice %13 {offsets = [2, 1, 0], sizes = [8, 8, 4], strides = [1, 1, 1]} : vector<10x10x4xf32> to vector<8x8x4xf32>
    %22 = vector.extract_strided_slice %13 {offsets = [2, 2, 0], sizes = [8, 8, 4], strides = [1, 1, 1]} : vector<10x10x4xf32> to vector<8x8x4xf32>
    %23 = tpu.concatenate %14, %15, %16, %17, %18, %19, %20, %21, %22 in 2 : vector<8x8x4xf32>, vector<8x8x4xf32>, vector<8x8x4xf32>, vector<8x8x4xf32>, vector<8x8x4xf32>, vector<8x8x4xf32>, vector<8x8x4xf32>, vector<8x8x4xf32>, vector<8x8x4xf32> -> vector<8x8x36xf32>
    %24 = vector.shape_cast %23 : vector<8x8x36xf32> to vector<64x36xf32>
    %25 = arith.truncf %24 : vector<64x36xf32> to vector<64x36xbf16>
    %c0_5 = arith.constant 0 : index
    %c0_6 = arith.constant 0 : index
    %26 = vector.load %arg2[%c0_5, %c0_6] : memref<36x8xbf16, #tpu.memory_space<vmem>>, vector<36x8xbf16>
    %cst_7 = arith.constant dense<0.000000e+00> : vector<64x8xf32>
    %27 = tpu.matmul %25, %26, %cst_7 {dimension_numbers = #tpu.dot_dimension_numbers<[1], [0], [0], [1], [0, 0, 1, 1], [], []>} : vector<64x36xbf16>, vector<36x8xbf16>, vector<64x8xf32> -> vector<64x8xf32>
    %c0_8 = arith.constant 0 : index
    %c0_9 = arith.constant 0 : index
    %28 = vector.load %arg3[%c0_8, %c0_9] : memref<1x8xf32, #tpu.memory_space<vmem>>, vector<1x8xf32>
    %29 = vector.broadcast %28 : vector<1x8xf32> to vector<64x8xf32>
    %30 = arith.mulf %27, %29 : vector<64x8xf32>
    %c0_10 = arith.constant 0 : index
    %c0_11 = arith.constant 0 : index
    %31 = vector.load %arg4[%c0_10, %c0_11] : memref<1x8xf32, #tpu.memory_space<vmem>>, vector<1x8xf32>
    %32 = vector.broadcast %31 : vector<1x8xf32> to vector<64x8xf32>
    %33 = arith.addf %30, %32 : vector<64x8xf32>
    %cst_12 = arith.constant 0.000000e+00 : f32
    %34 = vector.broadcast %cst_12 : f32 to vector<64x8xf32>
    %35 = arith.maximumf %33, %34 : vector<64x8xf32>
    %36 = vector.shape_cast %35 : vector<64x8xf32> to vector<8x8x8xf32>
    %cst_13 = arith.constant 0.000000e+00 : f32
    %37 = vector.broadcast %cst_13 : f32 to vector<1x8x8xf32>
    %38 = tpu.concatenate %37, %36, %37 in 0 : vector<1x8x8xf32>, vector<8x8x8xf32>, vector<1x8x8xf32> -> vector<10x8x8xf32>
    %cst_14 = arith.constant 0.000000e+00 : f32
    %39 = vector.broadcast %cst_14 : f32 to vector<10x1x8xf32>
    %40 = tpu.concatenate %39, %38, %39 in 1 : vector<10x1x8xf32>, vector<10x8x8xf32>, vector<10x1x8xf32> -> vector<10x10x8xf32>
    %41 = vector.extract_strided_slice %40 {offsets = [0, 0, 0], sizes = [8, 8, 8], strides = [1, 1, 1]} : vector<10x10x8xf32> to vector<8x8x8xf32>
    %42 = vector.extract_strided_slice %40 {offsets = [0, 1, 0], sizes = [8, 8, 8], strides = [1, 1, 1]} : vector<10x10x8xf32> to vector<8x8x8xf32>
    %43 = vector.extract_strided_slice %40 {offsets = [0, 2, 0], sizes = [8, 8, 8], strides = [1, 1, 1]} : vector<10x10x8xf32> to vector<8x8x8xf32>
    %44 = vector.extract_strided_slice %40 {offsets = [1, 0, 0], sizes = [8, 8, 8], strides = [1, 1, 1]} : vector<10x10x8xf32> to vector<8x8x8xf32>
    %45 = vector.extract_strided_slice %40 {offsets = [1, 1, 0], sizes = [8, 8, 8], strides = [1, 1, 1]} : vector<10x10x8xf32> to vector<8x8x8xf32>
    %46 = vector.extract_strided_slice %40 {offsets = [1, 2, 0], sizes = [8, 8, 8], strides = [1, 1, 1]} : vector<10x10x8xf32> to vector<8x8x8xf32>
    %47 = vector.extract_strided_slice %40 {offsets = [2, 0, 0], sizes = [8, 8, 8], strides = [1, 1, 1]} : vector<10x10x8xf32> to vector<8x8x8xf32>
    %48 = vector.extract_strided_slice %40 {offsets = [2, 1, 0], sizes = [8, 8, 8], strides = [1, 1, 1]} : vector<10x10x8xf32> to vector<8x8x8xf32>
    %49 = vector.extract_strided_slice %40 {offsets = [2, 2, 0], sizes = [8, 8, 8], strides = [1, 1, 1]} : vector<10x10x8xf32> to vector<8x8x8xf32>
    %50 = tpu.concatenate %41, %42, %43, %44, %45, %46, %47, %48, %49 in 2 : vector<8x8x8xf32>, vector<8x8x8xf32>, vector<8x8x8xf32>, vector<8x8x8xf32>, vector<8x8x8xf32>, vector<8x8x8xf32>, vector<8x8x8xf32>, vector<8x8x8xf32>, vector<8x8x8xf32> -> vector<8x8x72xf32>
    %51 = vector.shape_cast %50 : vector<8x8x72xf32> to vector<64x72xf32>
    %52 = arith.truncf %51 : vector<64x72xf32> to vector<64x72xbf16>
    %c0_15 = arith.constant 0 : index
    %c0_16 = arith.constant 0 : index
    %53 = vector.load %arg5[%c0_15, %c0_16] : memref<8x72xbf16, #tpu.memory_space<vmem>>, vector<8x72xbf16>
    %cst_17 = arith.constant dense<0.000000e+00> : vector<8x64xf32>
    %54 = tpu.matmul %53, %52, %cst_17 {dimension_numbers = #tpu.dot_dimension_numbers<[1], [1], [0], [0], [0, 0, 1, 0], [], []>} : vector<8x72xbf16>, vector<64x72xbf16>, vector<8x64xf32> -> vector<8x64xf32>
    %c0_18 = arith.constant 0 : index
    %c0_19 = arith.constant 0 : index
    %55 = vector.load %arg6[%c0_18, %c0_19] : memref<8x1xf32, #tpu.memory_space<vmem>>, vector<8x1xf32>
    %56 = vector.broadcast %55 : vector<8x1xf32> to vector<8x64xf32>
    %57 = arith.mulf %54, %56 : vector<8x64xf32>
    %c0_20 = arith.constant 0 : index
    %c0_21 = arith.constant 0 : index
    %58 = vector.load %arg7[%c0_20, %c0_21] : memref<8x1xf32, #tpu.memory_space<vmem>>, vector<8x1xf32>
    %59 = vector.broadcast %58 : vector<8x1xf32> to vector<8x64xf32>
    %60 = arith.addf %57, %59 : vector<8x64xf32>
    %cst_22 = arith.constant 0.000000e+00 : f32
    %61 = vector.broadcast %cst_22 : f32 to vector<8x64xf32>
    %62 = arith.maximumf %60, %61 : vector<8x64xf32>
    %c0_23 = arith.constant 0 : index
    %c0_24 = arith.constant 0 : index
    %c0_25 = arith.constant 0 : index
    %63 = vector.load %arg8[%c0_23, %c0_24, %c0_25] : memref<1x8x64xf32, #tpu.memory_space<vmem>>, vector<1x8x64xf32>
    %64 = vector.shape_cast %63 : vector<1x8x64xf32> to vector<8x64xf32>
    %65 = vector.shape_cast %62 : vector<8x64xf32> to vector<1x8x64xf32>
    tpu.vector_store %arg8[%c0_23, %c0_24, %c0_25], %65 {strides = array<i32>} : memref<1x8x64xf32, #tpu.memory_space<vmem>>, vector<1x8x64xf32>,
    return
  }
  func.func @transform_0(%arg0: i32) -> (i32, i32, i32, i32, i32) {
    %c0_i32 = arith.constant 0 : i32
    %c0_i32_0 = arith.constant 0 : i32
    %c0_i32_1 = arith.constant 0 : i32
    %c0_i32_2 = arith.constant 0 : i32
    %c0_i32_3 = arith.constant 0 : i32
    return %arg0, %c0_i32, %c0_i32_0, %c0_i32_1, %c0_i32_2 : i32, i32, i32, i32, i32
  }
  func.func @transform_1(%arg0: i32) -> (i32, i32) {
    %c0_i32 = arith.constant 0 : i32
    %c0_i32_0 = arith.constant 0 : i32
    %c0_i32_1 = arith.constant 0 : i32
    return %c0_i32, %c0_i32_0 : i32, i32
  }
  func.func @transform_2(%arg0: i32) -> (i32, i32) {
    %c0_i32 = arith.constant 0 : i32
    %c0_i32_0 = arith.constant 0 : i32
    %c0_i32_1 = arith.constant 0 : i32
    return %c0_i32, %c0_i32_0 : i32, i32
  }
  func.func @transform_3(%arg0: i32) -> (i32, i32) {
    %c0_i32 = arith.constant 0 : i32
    %c0_i32_0 = arith.constant 0 : i32
    %c0_i32_1 = arith.constant 0 : i32
    return %c0_i32, %c0_i32_0 : i32, i32
  }
  func.func @transform_4(%arg0: i32) -> (i32, i32) {
    %c0_i32 = arith.constant 0 : i32
    %c0_i32_0 = arith.constant 0 : i32
    %c0_i32_1 = arith.constant 0 : i32
    return %c0_i32, %c0_i32_0 : i32, i32
  }
  func.func @transform_5(%arg0: i32) -> (i32, i32) {
    %c0_i32 = arith.constant 0 : i32
    %c0_i32_0 = arith.constant 0 : i32
    %c0_i32_1 = arith.constant 0 : i32
    return %c0_i32, %c0_i32_0 : i32, i32
  }
  func.func @transform_6(%arg0: i32) -> (i32, i32) {
    %c0_i32 = arith.constant 0 : i32
    %c0_i32_0 = arith.constant 0 : i32
    %c0_i32_1 = arith.constant 0 : i32
    return %c0_i32, %c0_i32_0 : i32, i32
  }
  func.func @transform_7(%arg0: i32) -> (i32, i32, i32) {
    %c0_i32 = arith.constant 0 : i32
    %c0_i32_0 = arith.constant 0 : i32
    %c0_i32_1 = arith.constant 0 : i32
    return %arg0, %c0_i32, %c0_i32_0 : i32, i32, i32
  }
}

</mosaic_0001>

<bundles_post_ra>
// kernel: tpu_custom_call.1
= control target key start
LH: loop header
LB: loop body
LE: loop exit
PB: predicated region body
PF: predicated region fallthrough
CT: control target
= control target key end

     0   :  { %12 = vsyncpa [#allocation3], 0  ;;  %s2735_s0 = inlined_call_operand.hbm [shape: f32[2,8,2,8,8], index: 0, kind: input, shape index: {}]   ;;  %s2736_s1 = inlined_call_operand.vmem [shape: bf16[36,8], index: 1, kind: input, shape index: {}]   ;;  %s2737_s2 = inlined_call_operand.vmem [shape: f32[1,8], index: 2, kind: input, shape index: {}]   ;;  %s2738_s3 = inlined_call_operand.vmem [shape: f32[1,8], index: 3, kind: input, shape index: {}]   ;;  %s2739_s4 = inlined_call_operand.vmem [shape: bf16[8,72], index: 4, kind: input, shape index: {}]   ;;  %s2740_s5 = inlined_call_operand.vmem [shape: f32[8,1], index: 5, kind: input, shape index: {}]   ;;  %s2741_s6 = inlined_call_operand.vmem [shape: f32[8,1], index: 6, kind: input, shape index: {}]   ;;  %s2742_s7 = inlined_call_operand.hbm [shape: f32[2,8,64], index: 7, kind: output, shape index: {}]  }
   0x1   :  { %14 = vsyncpa [#allocation3 + $0x1], 0 }
   0x2   :  { %15 = vsyncpa [#allocation4], 0 }
   0x3   :  { %17 = vsyncpa [#allocation4 + $0x1], 0  ;;  %s2045_s24 = smov 0   ;;  %s2047_s25 = smov 0  }
   0x4   :  { %s2049_s26 = smov 0   ;;  %s2051_s27 = smov 0  }
   0x5 LB: > { %s2066_s28 = sadd.s32 4294967295, %s1983_s27   ;;  %s1415_s29 = sadd.s32 4294967294, %s1983_s27   ;;  %s1983_s27 = sphi %s2051_s27, %s2755_s27   ;;  %s1979_s26 = sphi %s2049_s26, %s2754_s26   ;;  %s1975_s25 = sphi %s2047_s25, %s2753_s25   ;;  %s1971_s24 = sphi %s2045_s24, %s2752_s24  }
   0x6   : > { %s2070_s30 = sadd.s32 1, %s1983_s27   ;;  %s30_s8 = sadd.s32 1, %s1979_s26 }
   0x7   : > { %s27_s9 = ssub.s32 %s1983_s27, %s2070_s30  ;;  %p37_p0 = scmp.ne.s32.totalorder %s1979_s26, %s1975_s25 }
   0x8   : > { %p28_p1 = scmp.eq.s32.totalorder %s27_s9, 0  ;;  %p38_p2 = scmp.eq.s32.totalorder %s1983_s27, 0 }
   0x9   : > { %p43_p3 = scmp.ne.s32.totalorder %s1975_s25, %s1971_s24  ;;  %p44_p4 = scmp.eq.s32.totalorder %s2066_s28, 0 }
   0xa   : > { %s2082_s10 = scalar_select %p28_p1, %s1979_s26, %s30_s8  }
   0xb   : > { %p2084_p5 = por %p38_p2, %p37_p0  ;;  %p2088_p6 = por %p44_p4, %p43_p3 }
   0xc   : > { %p193_p7 = scmp.eq.s32.totalorder %s2066_s28, 1  ;;  %p199_p8 = scmp.eq.s32.totalorder %s1415_s29, 1 }
   0xd   : > { %p1490_p10 = scmp.lt.s32.totalorder %s1983_s27, 2  ;;  %s237_s15 = sand.u32 1, %s1979_s26  }
   0xe   : > { %p2095_p11 = por %p193_p7, %p37_p0  ;;  %p2099_p12 = por %p199_p8, %p43_p3 }
   0xf   : > { %s1438_s16 = sshll.u32 %s1983_s27, 11  ;;  %s1418_s17 = sshll.u32 %s237_s15, 7 }
  0x10   : > { %s2746_s13 = scalar_select %p2095_p11, 1, 0 }
  0x11   : > { %s2747_s14 = scalar_select %p2099_p12, 1, 0 }
  0x12   : > { %s2108_s20 = scalar_lea.hbm %s2735_s0, %s1438_s16  ;;  %s241_s21 = scalar_lea.vmem [#allocation2], %s1418_s17 }
  0x13   : > { %s248_s22 = sshll.u32 %s241_s21, 4  ;;  %p2112_p13 = pnand %p1490_p10, %p2084_p5  ;;  %s2116_s22 = int_to_ptr.vmem [resolvable:$true] %s248_s22 }
  0x14   : > { %s2118_s29 = scalar_lea.sflag [#allocation3], %s237_s15  ;;  %s1887_s8 = scalar_lea.hbm %s2108_s20, 2048 }
  0x15   : > { %p1888_p0 = scmp.ne.s32.totalorder %s2108_s20, %s1887_s8  ;;  %p1889_p1 = pneg %p2112_p13 }
  0x16   : > { %s1892_s16 = scalar_lea.hbm %s2735_s0, 4096  ;;  %p1893_p4 = scmp.lt.u32.totalorder %s2108_s20, %s2735_s0 }
  0x17   : > { %p1890_p2 = pnand %p1889_p1, %p1888_p0  ;;  %p1894_p5 = scmp.lt.u32.totalorder %s1892_s16, %s1887_s8 }
  0x18   : > { %p1896_p8 = scmp.lt.u32.totalorder %s1887_s8, %s2108_s20 }
  0x19   : > { %p1891_p3 = pneg %p1890_p2  ;;  %p1895_p7 = por %p1894_p5, %p1893_p4 }
  0x1b   : > { %p1897_p10 = por %p1896_p8, %p1895_p7 }
  0x1d   : > { %p1898_p9 = pnand %p1897_p10, %p1891_p3 }
  0x1f   : > { %1901 = shalt.err (!%p1898_p9)
}
  0x20   : > { %s1902_s15 = scalar_lea.vmem %s2116_s22, 2048  ;;  %s1985_s19 = smov [#allocation2]  }
  0x21   : > { %p1903_p0 = scmp.ne.s32.totalorder %s2116_s22, %s1902_s15  ;;  %s1907_s21 = sshll.u32 %s1985_s19, 4  ;;  %s1908_s21 = int_to_ptr.vmem [resolvable:$false] %s1907_s21 }
  0x22   : > { %s1909_s9 = scalar_lea.vmem %s1908_s21, 4096  ;;  %p1910_p11 = scmp.lt.s32.totalorder %s2116_s22, %s1908_s21 }
  0x23   : > { %p1905_p2 = pnand %p1903_p0, %p1889_p1  ;;  %p1911_p4 = scmp.lt.s32.totalorder %s1909_s9, %s1902_s15 }
  0x25   : > { %p1906_p12 = pneg %p1905_p2  ;;  %p1912_p5 = por %p1911_p4, %p1910_p11 }
  0x27   : > { %p1913_p7 = pnand %p1912_p5, %p1906_p12 }
  0x29   : > { %1916 = shalt.err (!%p1913_p7)
}
  0x2a   : > { %s1986_s8 = smov 128   ;;  %s1987_s11 = smov 8  }
  0x2b   : > { %1485 = dma.hbm_to_vmem [thread:$0]  (!%p2112_p13), %s2108_s20, 2048, %s2116_s22, %s2118_s29, %s1986_s8, %s1986_s8, %s1987_s11  }
  0x2c   : > { %p1421_p9 = scmp.ge.s32.totalorder %s1983_s27, 1  ;;  %p256_p1 = scmp.lt.s32.totalorder %s1983_s27, 3 }
  0x2e   : > { %p257_p3 = pnand %p1421_p9, %p256_p1 }
  0x2f   : > { %s2149_s16 = sand.u32 (!%p257_p3), 1, %s1975_s25  }
  0x30   : > { %260 = sbr.rel (%p257_p3) target bundleno = 994 (0x3e2), region = 48  ;;  %s1422_s17 = sshll.u32 (!%p257_p3), %s2149_s16, 7 }
  0x31   : > { %s263_s18 = scalar_lea.sflag (!%p257_p3), [#allocation3], %s2149_s16  ;;  %s266_s15 = scalar_lea.vmem (!%p257_p3), [#allocation2], %s1422_s17 }
  0x37   : > { %1962 = dma.done.wait (%p2088_p6), %s263_s18, 2048  }
  0x38   : > { %1964 = vsyncadd (%p2088_p6), %s263_s18, 4294965248  ;;  %v298_v0 = vld [vmem:[%s266_s15] sm:$0xff]  ;;  %v299_v1 = vld [vmem:[%s266_s15 + $0x8] sm:$0xff]  ;;  %v1988_v22 = vmov 0.0   ;;  %s1989_s12 = smov 124   ;;  %vm389_vm0 = vcmask 1040384  }
  0x39   : > { %v300_v2 = vld [vmem:[%s266_s15 + $0x10] sm:$0xff]  ;;  %v301_v3 = vld [vmem:[%s266_s15 + $0x18] sm:$0xff]  ;;  %v314_v4 = vmax.f32 %v298_v0, %v299_v1  ;;  %v306_v5 = vld [vmem:[%s266_s15 + $0x40] sm:$0xff]  ;;  %1465 = vmatprep.subr.bf16.mxu1 %v1988_v22  ;;  %s1990_s20 = smov 12   ;;  %v371_v56 = vrot.slane %v1988_v22, 7  ;;  %s1991_s22 = smov 24  }
  0x3a   : > { %v307_v6 = vld [vmem:[%s266_s15 + $0x48] sm:$0xff]  ;;  %v315_v7 = vmax.f32 %v300_v2, %v301_v3  ;;  %v308_v8 = vld [vmem:[%s266_s15 + $0x50] sm:$0xff]  ;;  %v309_v9 = vld [vmem:[%s266_s15 + $0x58] sm:$0xff]  ;;  %vm424_vm1 = vcmask 1046528   ;;  %vm473_vm2 = vcmask 1045504   ;;  %s1992_s23 = smov 4  }
  0x3b   : > { %v318_v10 = vmax.f32 %v306_v5, %v307_v6  ;;  %v302_v11 = vld [vmem:[%s266_s15 + $0x20] sm:$0xff]  ;;  %v319_v12 = vmax.f32 %v308_v8, %v309_v9  ;;  %v303_v13 = vld [vmem:[%s266_s15 + $0x28] sm:$0xff]  ;;  %v304_v14 = vld [vmem:[%s266_s15 + $0x30] sm:$0xff]  ;;  %v2198_v1 = vsel %vm389_vm0, 0.0, %v371_v56  ;;  %v399_v2 = vsel %vm389_vm0, %v371_v56, 0.0  ;;  %s1993_s29 = smov 8  }
  0x3c   : > { %v305_v15 = vld [vmem:[%s266_s15 + $0x38] sm:$0xff]  ;;  %v1542_v16 = vpack.i.bf16 %v315_v7, %v314_v4  ;;  %v316_v17 = vmax.f32 %v302_v11, %v303_v13  ;;  %v310_v19 = vld [vmem:[%s266_s15 + $0x60] sm:$0xff]  ;;  %v311_v20 = vld [vmem:[%s266_s15 + $0x68] sm:$0xff]  ;;  %v425_v8 = vrot.slane %v2198_v1, 1  ;;  %v426_v9 = vrot.slane %v399_v2, 1  ;;  %s1994_s9 = smov 16  }
  0x3d   : > { %v317_v18 = vmax.f32 %v304_v14, %v305_v15  ;;  %v312_v21 = vld [vmem:[%s266_s15 + $0x70] sm:$0xff]  ;;  %v1552_v23 = vpack.i.bf16 %v319_v12, %v318_v10  ;;  %v313_v24 = vld [vmem:[%s266_s15 + $0x78] sm:$0xff]  ;;  %v320_v25 = vmax.f32 %v310_v19, %v311_v20  ;;  %s1995_s17 = smov 20   ;;  %vm783_vm3 = vcmask 1041408   ;;  %s1998_s11 = smov 48  }
  0x3e   : > { %1543 = vrot.lane.b32.xlu0 %v1542_v16, %s1989_s12  ;;  %v321_v27 = vmax.f32 %v312_v21, %v313_v24  ;;  %v2232_v16 = vsel %vm424_vm1, %v425_v8, %v426_v9  ;;  %vm674_vm4 = vcmask 31744   ;;  %vm683_vm5 = vcmask 64512   ;;  %s2000_s18 = smov 64   ;;  %s2001_s15 = smov 56  }
  0x3f   : > { %v1547_v26 = vpack.i.bf16 %v317_v18, %v316_v17  ;;  %1553 = vrot.lane.b32.xlu1 %v1552_v23, %s1989_s12  ;;  %vm692_vm6 = vcmask 97280   ;;  %vm701_vm7 = vcmask 130048   ;;  %vm710_vm8 = vcmask 162816   ;;  %s1423_s19 = sshll.u32 %s2149_s16, 3  ;;  %s1435_s21 = sshll.u32 %s2066_s28, 7 }
  0x40   : > { %v1557_v28 = vpack.i.bf16 %v321_v27, %v320_v25  ;;  %vm719_vm9 = vcmask 195584   ;;  %vm728_vm10 = vcmask 228352   ;;  %vm737_vm11 = vcmask 261120   ;;  %s296_s8 = scalar_lea.vmem [#allocation5], %s1423_s19  ;;  %p2749_p11 = scmp.ne.s32.totalorder %s2746_s13, 0 }
  0x41   : > { %vm770_vm12 = vcmask 293888   ;;  %vm2002_vm13 = vmmov 0   ;;  %vm1218_vm14 = vcmask 326656   ;;  %vm1227_vm15 = vcmask 392192   ;;  %s2004_s28 = smov [#allocation5]  }
  0x42   : > { %1548 = vrot.lane.b32.xlu0 %v1547_v26, %s1989_s12  ;;  %1473 = vmatprep.mubr.msk.bf16.mxu1 %vm2002_vm13, %v1988_v22 }
  0x43   : > { %1558 = vrot.lane.b32.xlu1 %v1557_v28, %s1989_s12  ;;  %s1996_s12 = smov 28  }
  0xb0   : > { %v1544_v29 = vpop.permute.xlu0 %1543 }
  0xb1   : > { %v1546_v30 = vunpack.i.h.bf16 %v1544_v29  ;;  %v1545_v31 = vunpack.i.l.bf16 %v1544_v29  ;;  %v1554_v34 = vpop.permute.xlu1 %1553 }
  0xb2   : > { %v1556_v38 = vunpack.i.h.bf16 %v1554_v34  ;;  %v1555_v41 = vunpack.i.l.bf16 %v1554_v34 }
  0xb3   : > { %v355_v32 = vmax.f32 %v315_v7, %v1546_v30  ;;  %v354_v33 = vmax.f32 %v314_v4, %v1545_v31 }
  0xb4   : > { %v1549_v35 = vpop.permute.xlu0 %1548  ;;  %v2164_v45 = vmax.f32 %v319_v12, %v1556_v38  ;;  %v2168_v49 = vmax.f32 %v318_v10, %v1555_v41 }
  0xb5   : > { %v373_v36 = vrot.slane %v355_v32, 7  ;;  %v372_v37 = vrot.slane %v354_v33, 7  ;;  %v1551_v39 = vunpack.i.h.bf16 %v1549_v35  ;;  %v1550_v40 = vunpack.i.l.bf16 %v1549_v35  ;;  %v1559_v44 = vpop.permute.xlu1 %1558 }
  0xb6   : > { %v1561_v46 = vunpack.i.h.bf16 %v1559_v44  ;;  %v1560_v50 = vunpack.i.l.bf16 %v1559_v44  ;;  %v377_v54 = vrot.slane %v2164_v45, 7  ;;  %v376_v57 = vrot.slane %v2168_v49, 7 }
  0xb7   : > { %v2159_v42 = vsel %vm389_vm0, 0.0, %v373_v36  ;;  %v2162_v43 = vsel %vm389_vm0, 0.0, %v372_v37  ;;  %v2166_v47 = vmax.f32 %v317_v18, %v1551_v39  ;;  %v356_v48 = vmax.f32 %v316_v17, %v1550_v40 }
  0xb8   : > { %v1562_v51 = vpack.i.bf16 %v2159_v42, %v2162_v43  ;;  %v2174_v55 = vmax.f32 %v321_v27, %v1561_v46  ;;  %v2185_v60 = vmax.f32 %v320_v25, %v1560_v50  ;;  %v2190_v61 = vsel %vm389_vm0, 0.0, %v377_v54  ;;  %v1884_v50 = vld [vmem:[%s2736_s1] sm:$0xff]  }
  0xb9   : > { %v375_v52 = vrot.slane %v2166_v47, 7  ;;  %v374_v53 = vrot.slane %v356_v48, 7  ;;  %v2204_v3 = vsel %vm389_vm0, 0.0, %v376_v57  ;;  %v400_v5 = vsel %vm389_vm0, %v372_v37, 0.0  ;;  %1451 = vmatprep.subr.bf16.mxu0 %v1884_v50 }
  0xba   : > { %1563 = vrot.lane.b32.xlu0 %v1562_v51, %s1990_s20  ;;  %v379_v62 = vrot.slane %v2174_v55, 7  ;;  %v378_v4 = vrot.slane %v2185_v60, 7  ;;  %v1582_v6 = vpack.i.bf16 %v2190_v61, %v2204_v3  ;;  %v429_v11 = vrot.slane %v400_v5, 1  ;;  %1452 = vmatpush3.bf16.msra.mxu0 %v1884_v50 }
  0xbb   : > { %v2180_v58 = vsel %vm389_vm0, 0.0, %v375_v52  ;;  %v2183_v59 = vsel %vm389_vm0, 0.0, %v374_v53  ;;  %v428_v13 = vrot.slane %v2162_v43, 1  ;;  %v402_v14 = vsel %vm389_vm0, %v374_v53, 0.0 }
  0xbc   : > { %v1567_v63 = vpack.i.bf16 %v2180_v58, %v2183_v59  ;;  %v1572_v0 = vpack.i.bf16 %v2183_v59, %v2159_v42  ;;  %v2215_v7 = vsel %vm389_vm0, 0.0, %v379_v62  ;;  %v1577_v10 = vpack.i.bf16 %v2204_v3, %v2180_v58 }
  0xbd   : > { %v2223_v12 = vsel %vm389_vm0, 0.0, %v378_v4  ;;  %v474_v17 = vrot.slane %v2198_v1, 2  ;;  %v475_v18 = vrot.slane %v399_v2, 2  ;;  %v401_v19 = vsel %vm389_vm0, %v373_v36, 0.0  ;;  %v1885_v2 = vld [vmem:[%s2736_s1 + $0x8] sm:$0xff]  }
  0xbe   : > { %1568 = vrot.lane.b32.xlu1 %v1567_v63, %s1990_s20  ;;  %1573 = vrot.lane.b32.xlu0 %v1572_v0, %s1991_s22  ;;  %v1587_v15 = vpack.i.bf16 %v2215_v7, %v2223_v12  ;;  %v478_v20 = vrot.slane %v400_v5, 2  ;;  %v1592_v21 = vpack.i.bf16 %v2223_v12, %v2190_v61  ;;  %v435_v23 = vrot.slane %v402_v14, 1 }
  0xbf   : > { %v430_v24 = vsel %vm424_vm1, %v428_v13, %v429_v11  ;;  %v434_v25 = vrot.slane %v2183_v59, 1  ;;  %v477_v26 = vrot.slane %v2162_v43, 2  ;;  %v432_v27 = vrot.slane %v401_v19, 1  ;;  %1453 = vmatprep.subr.bf16.mxu0 %v1885_v2 }
  0xc0   : > { %v431_v28 = vrot.slane %v2159_v42, 1  ;;  %v1597_v29 = vpack.i.bf16 %v2198_v1, %v2215_v7  ;;  %v1602_v30 = vpack.i.bf16 %v430_v24, %v2232_v16  ;;  %v2248_v31 = vsel %vm473_vm2, %v474_v17, %v475_v18  ;;  %1454 = vmatpush3.bf16.msra.mxu0 %v1885_v2 }
  0xc1   : > { %v484_v32 = vrot.slane %v402_v14, 2  ;;  %v436_v33 = vsel %vm424_vm1, %v434_v25, %v435_v23  ;;  %v479_v34 = vsel %vm473_vm2, %v477_v26, %v478_v20  ;;  %v483_v35 = vrot.slane %v2183_v59, 2 }
  0xc2   : > { %1578 = vrot.lane.b32.xlu1 %v1577_v10, %s1991_s22  ;;  %1583 = vrot.lane.b32.xlu0 %v1582_v6, %s1990_s20  ;;  %v403_v36 = vsel %vm389_vm0, %v375_v52, 0.0  ;;  %v481_v37 = vrot.slane %v401_v19, 2  ;;  %v433_v38 = vsel %vm424_vm1, %v431_v28, %v432_v27  ;;  %v480_v39 = vrot.slane %v2159_v42, 2 }
  0xc3   : > { %v1607_v40 = vpack.i.bf16 %v436_v33, %v433_v38  ;;  %v1612_v41 = vpack.i.bf16 %v479_v34, %v2248_v31  ;;  %v438_v44 = vrot.slane %v403_v36, 1  ;;  %v485_v46 = vsel %vm473_vm2, %v483_v35, %v484_v32 }
  0xc4   : > { %v437_v47 = vrot.slane %v2180_v58, 1  ;;  %v482_v48 = vsel %vm473_vm2, %v480_v39, %v481_v37  ;;  %v1622_v52 = vpack.i.bf16 %v433_v38, %v430_v24  ;;  %v487_v53 = vrot.slane %v403_v36, 2 }
  0xc5   : > { %v1617_v51 = vpack.i.bf16 %v485_v46, %v482_v48  ;;  %v486_v63 = vrot.slane %v2180_v58, 2  ;;  %v404_v0 = vsel %vm389_vm0, %v376_v57, 0.0  ;;  %v1632_v6 = vpack.i.bf16 %v482_v48, %v479_v34  ;;  %v1886_v57 = vld [vmem:[%s2736_s1 + $0x10] ss:$0 sps:$4 sm:$0x33]  }
  0xc6   : > { %1588 = vrot.lane.b32.xlu1 %v1587_v15, %s1990_s20  ;;  %1593 = vrot.lane.b32.xlu0 %v1592_v21, %s1991_s22  ;;  %v439_v56 = vsel %vm424_vm1, %v437_v47, %v438_v44  ;;  %v441_v8 = vrot.slane %v404_v0, 1  ;;  %v440_v10 = vrot.slane %v2204_v3, 1  ;;  %v405_v11 = vsel %vm389_vm0, %v377_v54, 0.0  ;;  %s1997_s20 = smov 32  }
  0xc7   : > { %v1627_v5 = vpack.i.bf16 %v439_v56, %v436_v33  ;;  %v488_v9 = vsel %vm473_vm2, %v486_v63, %v487_v53  ;;  %v490_v13 = vrot.slane %v404_v0, 2  ;;  %v489_v15 = vrot.slane %v2204_v3, 2  ;;  %1477 = vmatprep.subr.msk.bf16.mxu0 %vm783_vm3, %v1886_v57 }
  0xc8   : > { %v1637_v49 = vpack.i.bf16 %v488_v9, %v485_v46  ;;  %v442_v14 = vsel %vm424_vm1, %v440_v10, %v441_v8  ;;  %v406_v17 = vsel %vm389_vm0, %v378_v4, 0.0  ;;  %v785_v18 = vsel %vm783_vm3, %v1886_v57, 0 }
  0xc9   : > { %v444_v19 = vrot.slane %v405_v11, 1  ;;  %v1647_v45 = vpack.i.bf16 %v442_v14, %v439_v56  ;;  %1456 = vmatpush3.bf16.msra.mxu0 %v785_v18  ;;  %v447_v54 = vrot.slane %v406_v17, 1  ;;  %v491_v20 = vsel %vm473_vm2, %v489_v15, %v490_v13 }
  0xca   : > { %1598 = vrot.lane.b32.xlu1 %v1597_v29, %s1991_s22  ;;  %1603 = vrot.lane.b32.xlu0 %v1602_v30, %s1992_s23  ;;  %v443_v21 = vrot.slane %v2190_v61, 1  ;;  %v446_v23 = vrot.slane %v2223_v12, 1  ;;  %v493_v60 = vrot.slane %v405_v11, 2  ;;  %v496_v4 = vrot.slane %v406_v17, 2 }
  0xcb   : > { %v1657_v24 = vpack.i.bf16 %v491_v20, %v488_v9  ;;  %v492_v27 = vrot.slane %v2190_v61, 2  ;;  %v495_v28 = vrot.slane %v2223_v12, 2  ;;  %v407_v29 = vsel %vm389_vm0, %v379_v62, 0.0 }
  0xcc   : > { %v445_v25 = vsel %vm424_vm1, %v443_v21, %v444_v19  ;;  %v448_v26 = vsel %vm424_vm1, %v446_v23, %v447_v54  ;;  %v549_v32 = vrot.slane %v407_v29, 1  ;;  %v548_v35 = vrot.slane %v2215_v7, 1 }
  0xcd   : > { %v1667_v30 = vpack.i.bf16 %v448_v26, %v445_v25  ;;  %v494_v33 = vsel %vm473_vm2, %v492_v27, %v493_v60  ;;  %v497_v34 = vsel %vm473_vm2, %v495_v28, %v496_v4  ;;  %v1682_v55 = vpack.i.bf16 %v445_v25, %v442_v14 }
  0xce   : > { %1608 = vrot.lane.b32.xlu1 %v1607_v40, %s1992_s23  ;;  %1613 = vrot.lane.b32.xlu0 %v1612_v41, %s1993_s29  ;;  %v1677_v36 = vpack.i.bf16 %v497_v34, %v494_v33  ;;  %v576_v37 = vrot.slane %v407_v29, 2  ;;  %v550_v62 = vsel %vm424_vm1, %v548_v35, %v549_v32  ;;  %v575_v38 = vrot.slane %v2215_v7, 2 }
  0xcf   : > { %v1687_v39 = vpack.i.bf16 %v550_v62, %v448_v26  ;;  %v1707_v46 = vpack.i.bf16 %v2232_v16, %v550_v62 }
  0xd0   : > { %v577_v41 = vsel %vm473_vm2, %v575_v38, %v576_v37 }
  0xd1   : > { %v1697_v44 = vpack.i.bf16 %v577_v41, %v497_v34  ;;  %v1717_v7 = vpack.i.bf16 %v2248_v31, %v577_v41 }
  0xd2   : > { %1618 = vrot.lane.b32.xlu1 %v1617_v51, %s1993_s29  ;;  %1623 = vrot.lane.b32.xlu0 %v1622_v52, %s1994_s9 }
  0xd6   : > { %1628 = vrot.lane.b32.xlu1 %v1627_v5, %s1994_s9  ;;  %1633 = vrot.lane.b32.xlu0 %v1632_v6, %s1995_s17 }
  0xda   : > { %1638 = vrot.lane.b32.xlu1 %v1637_v49, %s1995_s17  ;;  %1643 = vrot.lane.b32.xlu0 %v1607_v40, %s1996_s12  ;;  %v1692_v40 = vpack.i.bf16 %v494_v33, %v491_v20 }
  0xde   : > { %1648 = vrot.lane.b32.xlu1 %v1647_v45, %s1996_s12  ;;  %1653 = vrot.lane.b32.xlu0 %v1617_v51, %s1997_s20 }
  0xe2   : > { %1658 = vrot.lane.b32.xlu1 %v1657_v24, %s1997_s20  ;;  %1663 = vrot.lane.b32.xlu0 %v1647_v45, %s1992_s23 }
  0xe6   : > { %1668 = vrot.lane.b32.xlu1 %v1667_v30, %s1992_s23  ;;  %1673 = vrot.lane.b32.xlu0 %v1657_v24, %s1993_s29 }
  0xea   : > { %1678 = vrot.lane.b32.xlu1 %v1677_v36, %s1993_s29  ;;  %1683 = vrot.lane.b32.xlu0 %v1682_v55, %s1994_s9 }
  0xee   : > { %1688 = vrot.lane.b32.xlu1 %v1687_v39, %s1994_s9  ;;  %1693 = vrot.lane.b32.xlu0 %v1692_v40, %s1995_s17 }
  0xf2   : > { %1698 = vrot.lane.b32.xlu1 %v1697_v44, %s1995_s17  ;;  %1703 = vrot.lane.b32.xlu0 %v1667_v30, %s1996_s12  ;;  %s1999_s17 = smov 40  }
  0xf6   : > { %1708 = vrot.lane.b32.xlu1 %v1707_v46, %s1996_s12  ;;  %1713 = vrot.lane.b32.xlu0 %v1677_v36, %s1997_s20 }
  0xfa   : > { %1718 = vrot.lane.b32.xlu1 %v1717_v7, %s1997_s20 }
 0x12c   : > { %v1564_v47 = vpop.permute.xlu0 %1563 }
 0x12d   : > { %v1566_v60 = vunpack.i.h.bf16 %v1564_v47  ;;  %v1565_v4 = vunpack.i.l.bf16 %v1564_v47 }
 0x130   : > { %v2327_v48 = vpop.permute.xlu1 %1568  ;;  %v2329_v50 = vpop.permute.xlu0 %1573 }
 0x131   : > { %v1570_v26 = vunpack.i.l.bf16 %v2327_v48  ;;  %v1576_v40 = vunpack.i.h.bf16 %v2329_v50  ;;  %v1575_v41 = vunpack.i.l.bf16 %v2329_v50 }
 0x134   : > { %v2331_v51 = vpop.permute.xlu1 %1578  ;;  %v2333_v52 = vpop.permute.xlu0 %1583 }
 0x138   : > { %v2335_v53 = vpop.permute.xlu1 %1588  ;;  %v2337_v56 = vpop.permute.xlu0 %1593 }
 0x13c   : > { %v2339_v63 = vpop.permute.xlu1 %1598  ;;  %v1604_v0 = vpop.permute.xlu0 %1603 }
 0x13d   : > { %v1606_v6 = vunpack.i.h.bf16 %v1604_v0  ;;  %v1605_v8 = vunpack.i.l.bf16 %v1604_v0 }
 0x13f   : > { %v676_v14 = vsel %vm674_vm4, %v2162_v43, %v1606_v6  ;;  %v675_v15 = vsel %vm674_vm4, %v2198_v1, %v1605_v8  ;;  %v1571_v43 = vunpack.i.h.bf16 %v2327_v48 }
 0x140   : > { %v1609_v2 = vpop.permute.xlu1 %1608  ;;  %v1614_v5 = vpop.permute.xlu0 %1613 }
 0x141   : > { %v1616_v9 = vunpack.i.h.bf16 %v1614_v5  ;;  %v1615_v10 = vunpack.i.l.bf16 %v1614_v5  ;;  %v1611_v11 = vunpack.i.h.bf16 %v1609_v2  ;;  %v1610_v13 = vunpack.i.l.bf16 %v1609_v2 }
 0x143   : > { %v684_v19 = vsel %vm683_vm5, %v675_v15, %v1615_v10  ;;  %v685_v45 = vsel %vm683_vm5, %v676_v14, %v1616_v9  ;;  %v678_v27 = vsel %vm674_vm4, %v2183_v59, %v1611_v11  ;;  %v677_v28 = vsel %vm674_vm4, %v2159_v42, %v1610_v13 }
 0x144   : > { %v1619_v49 = vpop.permute.xlu1 %1618  ;;  %v1624_v57 = vpop.permute.xlu0 %1623  ;;  %v693_v32 = vsel %vm692_vm6, %v684_v19, %v1565_v4  ;;  %v694_v33 = vsel %vm692_vm6, %v685_v45, %v1566_v60  ;;  %v1581_v15 = vunpack.i.h.bf16 %v2331_v51 }
 0x145   : > { %v1621_v17 = vunpack.i.h.bf16 %v1619_v49  ;;  %v1620_v18 = vunpack.i.l.bf16 %v1619_v49  ;;  %v1626_v54 = vunpack.i.h.bf16 %v1624_v57  ;;  %v1625_v20 = vunpack.i.l.bf16 %v1624_v57 }
 0x147   : > { %v686_v29 = vsel %vm683_vm5, %v677_v28, %v1620_v18  ;;  %v687_v30 = vsel %vm683_vm5, %v678_v27, %v1621_v17  ;;  %v702_v34 = vsel %vm701_vm7, %v693_v32, %v1625_v20  ;;  %v703_v35 = vsel %vm701_vm7, %v694_v33, %v1626_v54 }
 0x148   : > { %v1629_v21 = vpop.permute.xlu1 %1628  ;;  %v1634_v23 = vpop.permute.xlu0 %1633  ;;  %v695_v7 = vsel %vm692_vm6, %v686_v29, %v1570_v26  ;;  %v696_v47 = vsel %vm692_vm6, %v687_v30, %v1571_v43  ;;  %v1580_v17 = vunpack.i.l.bf16 %v2331_v51 }
 0x149   : > { %v1636_v24 = vunpack.i.h.bf16 %v1634_v23  ;;  %v1635_v25 = vunpack.i.l.bf16 %v1634_v23  ;;  %v1631_v36 = vunpack.i.h.bf16 %v1629_v21  ;;  %v1630_v55 = vunpack.i.l.bf16 %v1629_v21 }
 0x14b   : > { %v711_v59 = vsel %vm710_vm8, %v702_v34, %v1635_v25  ;;  %v712_v42 = vsel %vm710_vm8, %v703_v35, %v1636_v24  ;;  %v704_v48 = vsel %vm701_vm7, %v695_v7, %v1630_v55  ;;  %v705_v0 = vsel %vm701_vm7, %v696_v47, %v1631_v36 }
 0x14c   : > { %v1639_v37 = vpop.permute.xlu1 %1638  ;;  %v1644_v62 = vpop.permute.xlu0 %1643  ;;  %v720_v6 = vsel %vm719_vm9, %v711_v59, %v1575_v41  ;;  %v721_v8 = vsel %vm719_vm9, %v712_v42, %v1576_v40  ;;  %v1586_v7 = vunpack.i.h.bf16 %v2333_v52  ;;  %v1585_v47 = vunpack.i.l.bf16 %v2333_v52 }
 0x14d   : > { %v1641_v38 = vunpack.i.h.bf16 %v1639_v37  ;;  %v1640_v39 = vunpack.i.l.bf16 %v1639_v37  ;;  %v1646_v44 = vunpack.i.h.bf16 %v1644_v62  ;;  %v1645_v46 = vunpack.i.l.bf16 %v1644_v62 }
 0x14f   : > { %v713_v50 = vsel %vm710_vm8, %v704_v48, %v1640_v39  ;;  %v714_v9 = vsel %vm710_vm8, %v705_v0, %v1641_v38  ;;  %v729_v13 = vsel %vm728_vm10, %v720_v6, %v1645_v46  ;;  %v730_v14 = vsel %vm728_vm10, %v721_v8, %v1646_v44 }
 0x150   : > { %v1649_v2 = vpop.permute.xlu1 %1648  ;;  %v1654_v5 = vpop.permute.xlu0 %1653  ;;  %v722_v21 = vsel %vm719_vm9, %v713_v50, %v1580_v17  ;;  %v723_v23 = vsel %vm719_vm9, %v714_v9, %v1581_v15  ;;  %v1596_v15 = vunpack.i.h.bf16 %v2337_v56  ;;  %v1595_v17 = vunpack.i.l.bf16 %v2337_v56 }
 0x151   : > { %v1656_v10 = vunpack.i.h.bf16 %v1654_v5  ;;  %v1655_v49 = vunpack.i.l.bf16 %v1654_v5  ;;  %v1651_v57 = vunpack.i.h.bf16 %v1649_v2  ;;  %v1650_v11 = vunpack.i.l.bf16 %v1649_v2 }
 0x153   : > { %v738_v18 = vsel %vm737_vm11, %v729_v13, %v1655_v49  ;;  %v739_v19 = vsel %vm737_vm11, %v730_v14, %v1656_v10  ;;  %v731_v24 = vsel %vm728_vm10, %v722_v21, %v1650_v11  ;;  %v732_v25 = vsel %vm728_vm10, %v723_v23, %v1651_v57 }
 0x154   : > { %v1659_v45 = vpop.permute.xlu1 %1658  ;;  %v1664_v54 = vpop.permute.xlu0 %1663  ;;  %v746_v20 = vpack.c.bf16 %v739_v19, %v738_v18 }
 0x155   : > { %v1661_v60 = vunpack.i.h.bf16 %v1659_v45  ;;  %v1660_v4 = vunpack.i.l.bf16 %v1659_v45  ;;  %v1666_v29 = vunpack.i.h.bf16 %v1664_v54  ;;  %v1665_v30 = vunpack.i.l.bf16 %v1664_v54 }
 0x156   : > { %1457 = vmatprep.mubr.msk.bf16.mxu0 %vm770_vm12, %v746_v20 }
 0x157   : > { %v740_v51 = vsel %vm737_vm11, %v731_v24, %v1660_v4  ;;  %v741_v43 = vsel %vm737_vm11, %v732_v25, %v1661_v60  ;;  %v680_v37 = vsel %vm674_vm4, %v2204_v3, %v1666_v29  ;;  %v679_v62 = vsel %vm674_vm4, %v2180_v58, %v1665_v30 }
 0x158   : > { %v747_v26 = vpack.c.bf16 %v741_v43, %v740_v51  ;;  %v1669_v27 = vpop.permute.xlu1 %1668  ;;  %v1674_v28 = vpop.permute.xlu0 %1673  ;;  %v1591_v3 = vunpack.i.h.bf16 %v2335_v53  ;;  %v1590_v58 = vunpack.i.l.bf16 %v2335_v53  ;;  %v1601_v30 = vunpack.i.h.bf16 %v2339_v63 }
 0x159   : > { %v1676_v32 = vunpack.i.h.bf16 %v1674_v28  ;;  %v1675_v33 = vunpack.i.l.bf16 %v1674_v28  ;;  %v1671_v36 = vunpack.i.h.bf16 %v1669_v27  ;;  %v1670_v55 = vunpack.i.l.bf16 %v1669_v27 }
 0x15a   : > { %1458 = vmatmul.mubr.msk.bf16.vlgmr.msra.gmra.mrb[0].mxu0 %vm770_vm12, %v747_v26 }
 0x15b   : > { %v688_v38 = vsel %vm683_vm5, %v679_v62, %v1675_v33  ;;  %v689_v39 = vsel %vm683_vm5, %v680_v37, %v1676_v32  ;;  %v682_v2 = vsel %vm674_vm4, %v2223_v12, %v1671_v36  ;;  %v681_v5 = vsel %vm674_vm4, %v2190_v61, %v1670_v55 }
 0x15c   : > { %v1679_v34 = vpop.permute.xlu1 %1678  ;;  %v1684_v35 = vpop.permute.xlu0 %1683  ;;  %v697_v50 = vsel %vm692_vm6, %v688_v38, %v1585_v47  ;;  %v698_v52 = vsel %vm692_vm6, %v689_v39, %v1586_v7  ;;  %v1600_v32 = vunpack.i.l.bf16 %v2339_v63 }
 0x15d   : > { %v1681_v59 = vunpack.i.h.bf16 %v1679_v34  ;;  %v1680_v42 = vunpack.i.l.bf16 %v1679_v34  ;;  %v1686_v40 = vunpack.i.h.bf16 %v1684_v35  ;;  %v1685_v41 = vunpack.i.l.bf16 %v1684_v35 }
 0x15f   : > { %v690_v6 = vsel %vm683_vm5, %v681_v5, %v1680_v42  ;;  %v691_v8 = vsel %vm683_vm5, %v682_v2, %v1681_v59  ;;  %v706_v9 = vsel %vm701_vm7, %v697_v50, %v1685_v41  ;;  %v707_v10 = vsel %vm701_vm7, %v698_v52, %v1686_v40  ;;  %v2434_v41 = vld [vmem:[%s2737_s2] ss:$0 sm:$0xff] }
 0x160   : > { %v1689_v44 = vpop.permute.xlu1 %1688  ;;  %v1694_v46 = vpop.permute.xlu0 %1693  ;;  %v699_v45 = vsel %vm692_vm6, %v690_v6, %v1590_v58  ;;  %v700_v54 = vsel %vm692_vm6, %v691_v8, %v1591_v3 }
 0x161   : > { %v1696_v48 = vunpack.i.h.bf16 %v1694_v46  ;;  %v1695_v0 = vunpack.i.l.bf16 %v1694_v46  ;;  %v1691_v49 = vunpack.i.h.bf16 %v1689_v44  ;;  %v1690_v53 = vunpack.i.l.bf16 %v1689_v44  ;;  %v2439_v46 = vld [vmem:[%s2738_s3] ss:$0 sm:$0xff] }
 0x163   : > { %v715_v12 = vsel %vm710_vm8, %v706_v9, %v1695_v0  ;;  %v716_v61 = vsel %vm710_vm8, %v707_v10, %v1696_v48  ;;  %v708_v20 = vsel %vm701_vm7, %v699_v45, %v1690_v53  ;;  %v709_v21 = vsel %vm701_vm7, %v700_v54, %v1691_v49 }
 0x164   : > { %v1699_v57 = vpop.permute.xlu1 %1698  ;;  %v1704_v11 = vpop.permute.xlu0 %1703  ;;  %v724_v23 = vsel %vm719_vm9, %v715_v12, %v1595_v17  ;;  %v725_v60 = vsel %vm719_vm9, %v716_v61, %v1596_v15 }
 0x165   : > { %v1701_v13 = vunpack.i.h.bf16 %v1699_v57  ;;  %v1700_v14 = vunpack.i.l.bf16 %v1699_v57  ;;  %v1706_v18 = vunpack.i.h.bf16 %v1704_v11  ;;  %v1705_v19 = vunpack.i.l.bf16 %v1704_v11 }
 0x167   : > { %v717_v25 = vsel %vm710_vm8, %v708_v20, %v1700_v14  ;;  %v718_v56 = vsel %vm710_vm8, %v709_v21, %v1701_v13  ;;  %v733_v26 = vsel %vm728_vm10, %v724_v23, %v1705_v19  ;;  %v734_v27 = vsel %vm728_vm10, %v725_v60, %v1706_v18 }
 0x168   : > { %v1709_v4 = vpop.permute.xlu1 %1708  ;;  %v1714_v24 = vpop.permute.xlu0 %1713  ;;  %v726_v55 = vsel %vm719_vm9, %v717_v25, %v1600_v32  ;;  %v727_v37 = vsel %vm719_vm9, %v718_v56, %v1601_v30 }
 0x169   : > { %v1716_v51 = vunpack.i.h.bf16 %v1714_v24  ;;  %v1715_v43 = vunpack.i.l.bf16 %v1714_v24  ;;  %v1711_v28 = vunpack.i.h.bf16 %v1709_v4  ;;  %v1710_v29 = vunpack.i.l.bf16 %v1709_v4 }
 0x16b   : > { %v742_v33 = vsel %vm737_vm11, %v733_v26, %v1715_v43  ;;  %v743_v34 = vsel %vm737_vm11, %v734_v27, %v1716_v51  ;;  %v735_v42 = vsel %vm728_vm10, %v726_v55, %v1710_v29  ;;  %v736_v38 = vsel %vm728_vm10, %v727_v37, %v1711_v28 }
 0x16c   : > { %v748_v35 = vpack.c.bf16 %v743_v34, %v742_v33  ;;  %v1719_v36 = vpop.permute.xlu1 %1718 }
 0x16d   : > { %v1721_v62 = vunpack.i.h.bf16 %v1719_v36  ;;  %v1720_v59 = vunpack.i.l.bf16 %v1719_v36 }
 0x16e   : > { %1461 = vmatprep.mubr.msk.bf16.mxu0 %vm770_vm12, %v748_v35 }
 0x16f   : > { %v744_v63 = vsel %vm737_vm11, %v735_v42, %v1720_v59  ;;  %v745_v39 = vsel %vm737_vm11, %v736_v38, %v1721_v62 }
 0x170   : > { %v749_v40 = vpack.c.bf16 %v745_v39, %v744_v63 }
 0x172   : > { %1462 = vmatmul.mubr.msk.bf16.gmra.mrb[4].mxu0 %vm770_vm12, %v749_v40 }
 0x22d   : > { %v1459_v44 = vpop.f32.mrb[0].mxu0 }
 0x22e   : > { %v861_v7 = vmul.f32 %v1459_v44, %v2434_v41  ;;  %v821_v47 = vpop.f32.mrb[1].mxu0 }
 0x22f   : > { %v859_v48 = vmul.f32 %v2434_v41, %v821_v47  ;;  %v1460_v0 = vpop.f32.mrb[2].mxu0 }
 0x230   : > { %v876_v3 = vadd.f32 %v2439_v46, %v861_v7  ;;  %v862_v58 = vmul.f32 %v1460_v0, %v2434_v41  ;;  %v824_v2 = vpop.f32.mrb[3].mxu0 }
 0x231   : > { %v874_v5 = vadd.f32 %v2439_v46, %v859_v48  ;;  %v860_v6 = vmul.f32 %v2434_v41, %v824_v2 }
 0x232   : > { %v884_v8 = vmax.f32 %v876_v3, 0.0  ;;  %v877_v50 = vadd.f32 %v2439_v46, %v862_v58 }
 0x233   : > { %v882_v52 = vmax.f32 %v874_v5, 0.0  ;;  %v875_v9 = vadd.f32 %v2439_v46, %v860_v6 }
 0x234   : > { %v900_v10 = vrot.slane %v884_v8, 7  ;;  %v885_v49 = vmax.f32 %v877_v50, 0.0 }
 0x235   : > { %v898_v53 = vrot.slane %v882_v52, 7  ;;  %v883_v57 = vmax.f32 %v875_v9, 0.0 }
 0x236   : > { %v2450_v11 = vsel %vm389_vm0, 0.0, %v900_v10  ;;  %v924_v12 = vsel %vm389_vm0, %v900_v10, 0.0  ;;  %v901_v61 = vrot.slane %v885_v49, 7 }
 0x237   : > { %v951_v13 = vrot.slane %v924_v12, 1  ;;  %v996_v14 = vrot.slane %v924_v12, 2  ;;  %v2454_v15 = vsel %vm389_vm0, 0.0, %v898_v53  ;;  %v922_v17 = vsel %vm389_vm0, %v898_v53, 0.0 }
 0x238   : > { %v945_v18 = vrot.slane %v922_v17, 1  ;;  %v990_v19 = vrot.slane %v922_v17, 2  ;;  %v2458_v45 = vsel %vm389_vm0, 0.0, %v901_v61  ;;  %v925_v54 = vsel %vm389_vm0, %v901_v61, 0.0 }
 0x239   : > { %v954_v20 = vrot.slane %v925_v54, 1  ;;  %v999_v21 = vrot.slane %v925_v54, 2  ;;  %v899_v23 = vrot.slane %v883_v57, 7  ;;  %v1722_v60 = vpack.i.bf16 %v2458_v45, %v2450_v11 }
 0x23a   : > { %v989_v4 = vrot.slane %v2454_v15, 2  ;;  %v944_v24 = vrot.slane %v2454_v15, 1  ;;  %v950_v25 = vrot.slane %v2450_v11, 1  ;;  %v953_v56 = vrot.slane %v2458_v45, 1 }
 0x23b   : > { %v2468_v51 = vsel %vm389_vm0, 0.0, %v899_v23  ;;  %v923_v43 = vsel %vm389_vm0, %v899_v23, 0.0  ;;  %1723 = vrot.lane.b32.xlu0 %v1722_v60, %s1991_s22  ;;  %v995_v26 = vrot.slane %v2450_v11, 2  ;;  %v998_v27 = vrot.slane %v2458_v45, 2 }
 0x23c   : > { %v948_v28 = vrot.slane %v923_v43, 1  ;;  %v993_v29 = vrot.slane %v923_v43, 2  ;;  %v1732_v30 = vpack.i.bf16 %v2450_v11, %v2468_v51  ;;  %v1727_v32 = vpack.i.bf16 %v2468_v51, %v2454_v15 }
 0x23d   : > { %v991_v33 = vsel %vm473_vm2, %v989_v4, %v990_v19  ;;  %v952_v34 = vsel %vm424_vm1, %v950_v25, %v951_v13  ;;  %v2481_v35 = vsel %vm424_vm1, %v953_v56, %v954_v20  ;;  %v946_v36 = vsel %vm424_vm1, %v944_v24, %v945_v18 }
 0x23e   : > { %1733 = vrot.lane.b32.xlu1 %v1732_v30, %s1998_s11  ;;  %v1747_v55 = vpack.i.bf16 %v2481_v35, %v952_v34  ;;  %v997_v37 = vsel %vm473_vm2, %v995_v26, %v996_v14  ;;  %v2489_v62 = vsel %vm473_vm2, %v998_v27, %v999_v21  ;;  %v947_v59 = vrot.slane %v2468_v51, 1 }
 0x23f   : > { %1728 = vrot.lane.b32.xlu0 %v1727_v32, %s1991_s22  ;;  %v992_v42 = vrot.slane %v2468_v51, 2  ;;  %v1742_v38 = vpack.i.bf16 %v991_v33, %v2248_v31  ;;  %v1752_v63 = vpack.i.bf16 %v2489_v62, %v997_v37  ;;  %v1737_v39 = vpack.i.bf16 %v946_v36, %v2232_v16 }
 0x240   : > { %v949_v40 = vsel %vm424_vm1, %v947_v59, %v948_v28 }
 0x241   : > { %v994_v44 = vsel %vm473_vm2, %v992_v42, %v993_v29  ;;  %v1757_v7 = vpack.i.bf16 %v949_v40, %v946_v36  ;;  %v1767_v0 = vpack.i.bf16 %v952_v34, %v949_v40 }
 0x242   : > { %1743 = vrot.lane.b32.xlu1 %v1742_v38, %s1994_s9  ;;  %v1762_v47 = vpack.i.bf16 %v994_v44, %v991_v33  ;;  %v1772_v48 = vpack.i.bf16 %v997_v37, %v994_v44 }
 0x243   : > { %1738 = vrot.lane.b32.xlu0 %v1737_v39, %s1993_s29 }
 0x245   : > { %v1463_v3 = vpop.f32.mrb[4].mxu0 }
 0x246   : > { %1748 = vrot.lane.b32.xlu1 %v1747_v55, %s1997_s20  ;;  %v865_v58 = vmul.f32 %v1463_v3, %v2434_v41  ;;  %v837_v2 = vpop.f32.mrb[5].mxu0 }
 0x247   : > { %v863_v5 = vmul.f32 %v2434_v41, %v837_v2  ;;  %1753 = vrot.lane.b32.xlu0 %v1752_v63, %s1999_s17  ;;  %v1464_v6 = vpop.f32.mrb[6].mxu0 }
 0x248   : > { %v880_v8 = vadd.f32 %v2439_v46, %v865_v58  ;;  %v866_v50 = vmul.f32 %v1464_v6, %v2434_v41  ;;  %v840_v52 = vpop.f32.mrb[7].mxu0 }
 0x249   : > { %v878_v9 = vadd.f32 %v2439_v46, %v863_v5  ;;  %v864_v10 = vmul.f32 %v2434_v41, %v840_v52 }
 0x24a   : > { %v888_v49 = vmax.f32 %v880_v8, 0.0  ;;  %v881_v53 = vadd.f32 %v2439_v46, %v866_v50  ;;  %1758 = vrot.lane.b32.xlu1 %v1757_v7, %s1997_s20 }
 0x24b   : > { %v886_v57 = vmax.f32 %v878_v9, 0.0  ;;  %v879_v12 = vadd.f32 %v2439_v46, %v864_v10  ;;  %1763 = vrot.lane.b32.xlu0 %v1762_v47, %s1999_s17 }
 0x24c   : > { %v904_v61 = vrot.slane %v888_v49, 7  ;;  %v889_v13 = vmax.f32 %v881_v53, 0.0  ;;  %v1315_v53 = vld [vmem:[%s2740_s5] sm:$0xff] }
 0x24d   : > { %v902_v14 = vrot.slane %v886_v57, 7  ;;  %v887_v17 = vmax.f32 %v879_v12, 0.0  ;;  %v2003_v57 = vmov 0   ;;  %v1322_v12 = vld [vmem:[%s2741_s6] sm:$0xff] }
 0x24e   : > { %v928_v18 = vsel %vm389_vm0, %v904_v61, 0.0  ;;  %v905_v19 = vrot.slane %v889_v13, 7  ;;  %1773 = vrot.lane.b32.xlu1 %v1772_v48, %s2000_s18  ;;  %v2515_v41 = vsel %vm389_vm0, 0.0, %v904_v61  ;;  %1882 = vset.pattern.permute.xlu0 %v2003_v57 }
 0x24f   : > { %v2518_v54 = vsel %vm389_vm0, 0.0, %v902_v14  ;;  %v926_v46 = vsel %vm389_vm0, %v902_v14, 0.0  ;;  %1768 = vrot.lane.b32.xlu0 %v1767_v0, %s2001_s15  ;;  %v963_v20 = vrot.slane %v928_v18, 1  ;;  %v903_v25 = vrot.slane %v887_v17, 7  ;;  %1883 = vset.pattern.permute.xlu1 %v2003_v57 }
 0x250   : > { %v921_v21 = vsel %vm389_vm0, 0.0, %v905_v19  ;;  %v929_v23 = vsel %vm389_vm0, %v905_v19, 0.0  ;;  %v957_v60 = vrot.slane %v926_v46, 1  ;;  %v1002_v4 = vrot.slane %v926_v46, 2 }
 0x251   : > { %v1061_v24 = vrot.slane %v929_v23, 1  ;;  %v1008_v56 = vrot.slane %v928_v18, 2  ;;  %v1001_v43 = vrot.slane %v2518_v54, 2  ;;  %v956_v26 = vrot.slane %v2518_v54, 1 }
 0x252   : > { %1783 = vrot.lane.b32.xlu1 %v1772_v48, %s1994_s9  ;;  %v962_v27 = vrot.slane %v2515_v41, 1  ;;  %v927_v28 = vsel %vm389_vm0, %v903_v25, 0.0  ;;  %v1787_v29 = vpack.i.bf16 %v2518_v54, %v2458_v45  ;;  %v1792_v30 = vpack.i.bf16 %v921_v21, %v2515_v41 }
 0x253   : > { %1778 = vrot.lane.b32.xlu0 %v1767_v0, %s1993_s29  ;;  %v1060_v32 = vrot.slane %v921_v21, 1  ;;  %v2534_v33 = vsel %vm389_vm0, 0.0, %v903_v25  ;;  %v960_v34 = vrot.slane %v927_v28, 1  ;;  %v1005_v36 = vrot.slane %v927_v28, 2 }
 0x254   : > { %v1007_v55 = vrot.slane %v2515_v41, 2  ;;  %v1003_v37 = vsel %vm473_vm2, %v1001_v43, %v1002_v4  ;;  %v958_v59 = vsel %vm424_vm1, %v956_v26, %v957_v60  ;;  %v964_v42 = vsel %vm424_vm1, %v962_v27, %v963_v20 }
 0x255   : > { %v1062_v38 = vsel %vm424_vm1, %v1060_v32, %v1061_v24  ;;  %v1812_v63 = vpack.i.bf16 %v1003_v37, %v2489_v62  ;;  %v1807_v39 = vpack.i.bf16 %v958_v59, %v2481_v35  ;;  %v1088_v40 = vrot.slane %v929_v23, 2 }
 0x256   : > { %1788 = vrot.lane.b32.xlu1 %v1787_v29, %s1998_s11  ;;  %v1827_v44 = vpack.i.bf16 %v1062_v38, %v964_v42  ;;  %v1004_v7 = vrot.slane %v2534_v33, 2  ;;  %v959_v47 = vrot.slane %v2534_v33, 1  ;;  %v1802_v48 = vpack.i.bf16 %v2515_v41, %v2534_v33 }
 0x257   : > { %1793 = vrot.lane.b32.xlu0 %v1792_v30, %s1991_s22  ;;  %v1087_v0 = vrot.slane %v921_v21, 2  ;;  %v1797_v3 = vpack.i.bf16 %v2534_v33, %v2518_v54  ;;  %v1009_v35 = vsel %vm473_vm2, %v1007_v55, %v1008_v56  ;;  %v1867_v9 = vpack.i.bf16 %v2198_v1, %v921_v21 }
 0x258   : > { %v1006_v58 = vsel %vm473_vm2, %v1004_v7, %v1005_v36  ;;  %v961_v62 = vsel %vm424_vm1, %v959_v47, %v960_v34  ;;  %v1872_v10 = vpack.i.bf16 %v2232_v16, %v1062_v38  ;;  %vm1236_vm0 = vcmask 457728  }
 0x259   : > { %v1837_v2 = vpack.i.bf16 %v1006_v58, %v1003_v37  ;;  %v1832_v5 = vpack.i.bf16 %v961_v62, %v958_v59  ;;  %v1842_v6 = vpack.i.bf16 %v964_v42, %v961_v62  ;;  %v1847_v8 = vpack.i.bf16 %v1009_v35, %v1006_v58 }
 0x25a   : > { %1803 = vrot.lane.b32.xlu1 %v1802_v48, %s1998_s11  ;;  %v1089_v50 = vsel %vm473_vm2, %v1087_v0, %v1088_v40  ;;  %vm1245_vm1 = vcmask 523264   ;;  %vm1259_vm2 = vcmask 588800  }
 0x25b   : > { %1798 = vrot.lane.b32.xlu0 %v1797_v3, %s1991_s22  ;;  %v1857_v52 = vpack.i.bf16 %v1089_v50, %v1009_v35  ;;  %v1877_v49 = vpack.i.bf16 %v2248_v31, %v1089_v50  ;;  %s1332_s22 = scalar_lea.sflag [#allocation4], %s2149_s16 }
 0x25e   : > { %1813 = vrot.lane.b32.xlu1 %v1812_v63, %s2000_s18 }
 0x25f   : > { %1808 = vrot.lane.b32.xlu0 %v1807_v39, %s2001_s15 }
 0x262   : > { %1823 = vrot.lane.b32.xlu1 %v1812_v63, %s1994_s9 }
 0x263   : > { %1818 = vrot.lane.b32.xlu0 %v1807_v39, %s1993_s29 }
 0x266   : > { %1828 = vrot.lane.b32.xlu1 %v1827_v44, %s1997_s20 }
 0x267   : > { %1838 = vrot.lane.b32.xlu0 %v1837_v2, %s1999_s17 }
 0x26a   : > { %1833 = vrot.lane.b32.xlu1 %v1832_v5, %s1997_s20 }
 0x26b   : > { %1843 = vrot.lane.b32.xlu0 %v1842_v6, %s2001_s15 }
 0x26e   : > { %1848 = vrot.lane.b32.xlu1 %v1847_v8, %s2000_s18 }
 0x26f   : > { %1853 = vrot.lane.b32.xlu0 %v1842_v6, %s1993_s29 }
 0x272   : > { %1863 = vrot.lane.b32.xlu1 %v1847_v8, %s1994_s9  ;;  %s1921_s9 = sshll.u32 %s2004_s28, 4  ;;  %s1922_s9 = int_to_ptr.vmem [resolvable:$false] %s1921_s9 }
 0x273   : > { %1858 = vrot.lane.b32.xlu0 %v1857_v52, %s1999_s17  ;;  %s1923_s12 = scalar_lea.vmem %s1922_s9, 256 }
 0x276   : > { %1868 = vrot.lane.b32.xlu1 %v1867_v9, %s1998_s11  ;;  %s1345_s11 = sshll.u32 %s296_s8, 4  ;;  %s2692_s11 = int_to_ptr.vmem [resolvable:$true] %s1345_s11 }
 0x277   : > { %1873 = vrot.lane.b32.xlu0 %v1872_v10, %s2001_s15  ;;  %s2690_s15 = scalar_lea.hbm %s2742_s7, %s1435_s21  ;;  %s1917_s29 = scalar_lea.vmem %s2692_s11, 128 }
 0x278   : > { %p1918_p6 = scmp.ne.s32.totalorder %s2692_s11, %s1917_s29  ;;  %p1924_p8 = scmp.lt.s32.totalorder %s2692_s11, %s1922_s9 }
 0x279   : > { %p1925_p10 = scmp.lt.s32.totalorder %s1923_s12, %s1917_s29 }
 0x27a   : > { %1878 = vrot.lane.b32.xlu1 %v1877_v49, %s2000_s18  ;;  %p1919_p12 = pnand %p1918_p6, %p2749_p11 }
 0x27b   : > { %1318 = vperm.xlu0 %1882, %v1315_v53   ;;  %p1926_p0 = por %p1925_p10, %p1924_p8 }
 0x27c   : > { %p1920_p13 = pneg %p1919_p12 }
 0x27e   : > { %1325 = vperm.xlu1 %1883, %v1322_v12   ;;  %p1927_p2 = pnand %p1926_p0, %p1920_p13 }
 0x2ad   : > { %v2582_v16 = vpop.permute.xlu0 %1723 }
 0x2ae   : > { %v1726_v8 = vunpack.i.h.bf16 %v2582_v16  ;;  %v1725_v9 = vunpack.i.l.bf16 %v2582_v16 }
 0x2b0   : > { %v1734_v61 = vpop.permute.xlu1 %1733 }
 0x2b1   : > { %v1729_v13 = vpop.permute.xlu0 %1728  ;;  %v1736_v59 = vunpack.i.h.bf16 %v1734_v61  ;;  %v1735_v42 = vunpack.i.l.bf16 %v1734_v61 }
 0x2b2   : > { %v1731_v25 = vunpack.i.h.bf16 %v1729_v13  ;;  %v1730_v56 = vunpack.i.l.bf16 %v1729_v13 }
 0x2b4   : > { %v1744_v31 = vpop.permute.xlu1 %1743 }
 0x2b5   : > { %v1739_v14 = vpop.permute.xlu0 %1738  ;;  %v1746_v21 = vunpack.i.h.bf16 %v1744_v31  ;;  %v1745_v23 = vunpack.i.l.bf16 %v1744_v31 }
 0x2b6   : > { %v1741_v17 = vunpack.i.h.bf16 %v1739_v14  ;;  %v1740_v18 = vunpack.i.l.bf16 %v1739_v14 }
 0x2b8   : > { %v1187_v19 = vsel %vm683_vm5, %v2454_v15, %v1741_v17  ;;  %v1186_v46 = vsel %vm683_vm5, %v2198_v1, %v1740_v18  ;;  %v2588_v20 = vpop.permute.xlu1 %1748 }
 0x2b9   : > { %v2590_v60 = vpop.permute.xlu0 %1753  ;;  %v1195_v4 = vsel %vm701_vm7, %v1187_v19, %v1746_v21  ;;  %v1194_v24 = vsel %vm701_vm7, %v1186_v46, %v1745_v23 }
 0x2ba   : > { %v1202_v28 = vsel %vm719_vm9, %v1194_v24, %v1730_v56  ;;  %v1203_v1 = vsel %vm719_vm9, %v1195_v4, %v1731_v25  ;;  %v1756_v46 = vunpack.i.h.bf16 %v2590_v60  ;;  %v1755_v21 = vunpack.i.l.bf16 %v2590_v60 }
 0x2bc   : > { %v1759_v43 = vpop.permute.xlu1 %1758 }
 0x2bd   : > { %v1761_v26 = vunpack.i.h.bf16 %v1759_v43  ;;  %v1760_v27 = vunpack.i.l.bf16 %v1759_v43  ;;  %v1764_v15 = vpop.permute.xlu0 %1763 }
 0x2be   : > { %v1766_v29 = vunpack.i.h.bf16 %v1764_v15  ;;  %v1765_v30 = vunpack.i.l.bf16 %v1764_v15 }
 0x2bf   : > { %v1211_v32 = vsel %vm737_vm11, %v1203_v1, %v1761_v26  ;;  %v1210_v34 = vsel %vm737_vm11, %v1202_v28, %v1760_v27 }
 0x2c0   : > { %v1219_v36 = vsel %vm1218_vm14, %v1210_v34, %v1765_v30  ;;  %v1220_v55 = vsel %vm1218_vm14, %v1211_v32, %v1766_v29  ;;  %v1774_v37 = vpop.permute.xlu1 %1773 }
 0x2c1   : > { %v1769_v38 = vpop.permute.xlu0 %1768  ;;  %v1776_v40 = vunpack.i.h.bf16 %v1774_v37  ;;  %v1775_v44 = vunpack.i.l.bf16 %v1774_v37  ;;  %v1228_v7 = vsel %vm1227_vm15, %v1219_v36, %v1735_v42  ;;  %v1229_v47 = vsel %vm1227_vm15, %v1220_v55, %v1736_v59 }
 0x2c2   : > { %v1771_v63 = vunpack.i.h.bf16 %v1769_v38  ;;  %v1770_v39 = vunpack.i.l.bf16 %v1769_v38 }
 0x2c4   : > { %v1784_v48 = vpop.permute.xlu1 %1783  ;;  %v1237_v0 = vsel %vm1236_vm0, %v1228_v7, %v1770_v39  ;;  %v1238_v3 = vsel %vm1236_vm0, %v1229_v47, %v1771_v63 }
 0x2c5   : > { %v1779_v58 = vpop.permute.xlu0 %1778  ;;  %v1246_v62 = vsel %vm1245_vm1, %v1237_v0, %v1775_v44  ;;  %v1247_v35 = vsel %vm1245_vm1, %v1238_v3, %v1776_v40  ;;  %v1786_v50 = vunpack.i.h.bf16 %v1784_v48  ;;  %v1785_v52 = vunpack.i.l.bf16 %v1784_v48 }
 0x2c6   : > { %v1781_v2 = vunpack.i.h.bf16 %v1779_v58  ;;  %v1780_v5 = vunpack.i.l.bf16 %v1779_v58  ;;  %v1254_v6 = vpack.c.bf16 %v1247_v35, %v1246_v62 }
 0x2c8   : > { %v1189_v10 = vsel %vm683_vm5, %v2450_v11, %v1781_v2  ;;  %v1188_v49 = vsel %vm683_vm5, %v2468_v51, %v1780_v5  ;;  %v1789_v53 = vpop.permute.xlu1 %1788  ;;  %v1264_v57 = vsel %vm1259_vm2, %v1254_v6, 0  ;;  %v1751_v11 = vunpack.i.h.bf16 %v2588_v20 }
 0x2c9   : > { %v1196_v12 = vsel %vm701_vm7, %v1188_v49, %v1785_v52  ;;  %v1197_v61 = vsel %vm701_vm7, %v1189_v10, %v1786_v50  ;;  %1466 = vmatpush3.bf16.xpose.msra.mxu1 %v1264_v57  ;;  %v2615_v13 = vpop.permute.xlu0 %1793  ;;  %v1750_v51 = vunpack.i.l.bf16 %v2588_v20  ;;  %v1791_v25 = vunpack.i.h.bf16 %v1789_v53 }
 0x2ca   : > { %v1204_v31 = vsel %vm719_vm9, %v1196_v12, %v1725_v9  ;;  %v1205_v16 = vsel %vm719_vm9, %v1197_v61, %v1726_v8  ;;  %1467 = vmatprep.subr.bf16.mxu1 %v1988_v22  ;;  %v1790_v56 = vunpack.i.l.bf16 %v1789_v53 }
 0x2cb   : > { %v1212_v17 = vsel %vm737_vm11, %v1204_v31, %v1750_v51  ;;  %v1213_v18 = vsel %vm737_vm11, %v1205_v16, %v1751_v11 }
 0x2cc   : > { %v1804_v14 = vpop.permute.xlu1 %1803  ;;  %v1221_v23 = vsel %vm1218_vm14, %v1212_v17, %v1755_v21  ;;  %v1222_v4 = vsel %vm1218_vm14, %v1213_v18, %v1756_v46 }
 0x2cd   : > { %v1799_v19 = vpop.permute.xlu0 %1798  ;;  %v1231_v27 = vsel %vm1227_vm15, %v1222_v4, %v1791_v25  ;;  %v1230_v15 = vsel %vm1227_vm15, %v1221_v23, %v1790_v56  ;;  %v1806_v52 = vunpack.i.h.bf16 %v1804_v14  ;;  %v1805_v9 = vunpack.i.l.bf16 %v1804_v14 }
 0x2ce   : > { %v1801_v0 = vunpack.i.h.bf16 %v1799_v19  ;;  %v1800_v3 = vunpack.i.l.bf16 %v1799_v19  ;;  %v1796_v56 = vunpack.i.h.bf16 %v2615_v13 }
 0x2d0   : > { %v1814_v24 = vpop.permute.xlu1 %1813 }
 0x2d1   : > { %v1809_v43 = vpop.permute.xlu0 %1808  ;;  %v1816_v28 = vunpack.i.h.bf16 %v1814_v24  ;;  %v1815_v1 = vunpack.i.l.bf16 %v1814_v24 }
 0x2d2   : > { %v1811_v26 = vunpack.i.h.bf16 %v1809_v43  ;;  %v1810_v20 = vunpack.i.l.bf16 %v1809_v43 }
 0x2d4   : > { %v1240_v29 = vsel %vm1236_vm0, %v1231_v27, %v1811_v26  ;;  %v1239_v60 = vsel %vm1236_vm0, %v1230_v15, %v1810_v20  ;;  %v1824_v30 = vpop.permute.xlu1 %1823  ;;  %v1795_v27 = vunpack.i.l.bf16 %v2615_v13 }
 0x2d5   : > { %v1819_v32 = vpop.permute.xlu0 %1818  ;;  %v1248_v34 = vsel %vm1245_vm1, %v1239_v60, %v1815_v1  ;;  %v1249_v36 = vsel %vm1245_vm1, %v1240_v29, %v1816_v28  ;;  %v1826_v40 = vunpack.i.h.bf16 %v1824_v30  ;;  %v1825_v44 = vunpack.i.l.bf16 %v1824_v30 }
 0x2d6   : > { %v1821_v55 = vunpack.i.h.bf16 %v1819_v32  ;;  %v1820_v37 = vunpack.i.l.bf16 %v1819_v32  ;;  %v1255_v59 = vpack.c.bf16 %v1249_v36, %v1248_v34 }
 0x2d8   : > { %v1191_v42 = vsel %vm683_vm5, %v2518_v54, %v1821_v55  ;;  %v1190_v38 = vsel %vm683_vm5, %v2458_v45, %v1820_v37  ;;  %v2638_v63 = vpop.permute.xlu1 %1828  ;;  %v1267_v39 = vsel %vm1259_vm2, %v1255_v59, 0 }
 0x2d9   : > { %1468 = vmatpush3.bf16.xpose.msra.mxu1 %v1267_v39  ;;  %v1839_v7 = vpop.permute.xlu0 %1838  ;;  %v1199_v47 = vsel %vm701_vm7, %v1191_v42, %v1826_v40  ;;  %v1198_v48 = vsel %vm701_vm7, %v1190_v38, %v1825_v44  ;;  %v1831_v29 = vunpack.i.h.bf16 %v2638_v63 }
 0x2da   : > { %1469 = vmatprep.subr.bf16.mxu1 %v1988_v22  ;;  %v1841_v58 = vunpack.i.h.bf16 %v1839_v7  ;;  %v1840_v62 = vunpack.i.l.bf16 %v1839_v7  ;;  %v1206_v5 = vsel %vm719_vm9, %v1198_v48, %v1800_v3  ;;  %v1207_v6 = vsel %vm719_vm9, %v1199_v47, %v1801_v0 }
 0x2dc   : > { %v1834_v54 = vpop.permute.xlu1 %1833 }
 0x2dd   : > { %v1836_v45 = vunpack.i.h.bf16 %v1834_v54  ;;  %v1835_v35 = vunpack.i.l.bf16 %v1834_v54  ;;  %v1844_v2 = vpop.permute.xlu0 %1843 }
 0x2de   : > { %v1846_v8 = vunpack.i.h.bf16 %v1844_v2  ;;  %v1845_v50 = vunpack.i.l.bf16 %v1844_v2 }
 0x2df   : > { %v1215_v10 = vsel %vm737_vm11, %v1207_v6, %v1836_v45  ;;  %v1214_v49 = vsel %vm737_vm11, %v1206_v5, %v1835_v35  ;;  %v1258_v45 = vld [vmem:[%s2739_s4] sm:$0xf] }
 0x2e0   : > { %v1224_v53 = vsel %vm1218_vm14, %v1215_v10, %v1841_v58  ;;  %v1223_v57 = vsel %vm1218_vm14, %v1214_v49, %v1840_v62  ;;  %v1849_v12 = vpop.permute.xlu1 %1848 }
 0x2e1   : > { %v1232_v61 = vsel %vm1227_vm15, %v1223_v57, %v1805_v9  ;;  %v1233_v31 = vsel %vm1227_vm15, %v1224_v53, %v1806_v52  ;;  %v1851_v16 = vunpack.i.h.bf16 %v1849_v12  ;;  %v1850_v11 = vunpack.i.l.bf16 %v1849_v12  ;;  %v1854_v51 = vpop.permute.xlu0 %1853 }
 0x2e2   : > { %v1241_v17 = vsel %vm1236_vm0, %v1232_v61, %v1845_v50  ;;  %v1242_v14 = vsel %vm1236_vm0, %v1233_v31, %v1846_v8  ;;  %v1856_v18 = vunpack.i.h.bf16 %v1854_v51  ;;  %v1855_v19 = vunpack.i.l.bf16 %v1854_v51 }
 0x2e3   : > { %v1250_v46 = vsel %vm1245_vm1, %v1241_v17, %v1850_v11  ;;  %v1251_v21 = vsel %vm1245_vm1, %v1242_v14, %v1851_v16 }
 0x2e4   : > { %v1193_v23 = vsel %vm683_vm5, %v2515_v41, %v1856_v18  ;;  %v1192_v4 = vsel %vm683_vm5, %v2534_v33, %v1855_v19  ;;  %v1864_v24 = vpop.permute.xlu1 %1863  ;;  %v1256_v25 = vpack.c.bf16 %v1251_v21, %v1250_v46  ;;  %v1830_v41 = vunpack.i.l.bf16 %v2638_v63 }
 0x2e5   : > { %v1866_v43 = vunpack.i.h.bf16 %v1864_v24  ;;  %v1865_v26 = vunpack.i.l.bf16 %v1864_v24  ;;  %v1859_v20 = vpop.permute.xlu0 %1858 }
 0x2e6   : > { %v1861_v15 = vunpack.i.h.bf16 %v1859_v20  ;;  %v1860_v28 = vunpack.i.l.bf16 %v1859_v20  ;;  %v1270_v1 = vsel %vm1259_vm2, %v1256_v25, 0 }
 0x2e7   : > { %v1201_v60 = vsel %vm701_vm7, %v1193_v23, %v1866_v43  ;;  %v1200_v33 = vsel %vm701_vm7, %v1192_v4, %v1865_v26  ;;  %1470 = vmatpush3.bf16.xpose.msra.mxu1 %v1270_v1 }
 0x2e8   : > { %v1209_v30 = vsel %vm719_vm9, %v1201_v60, %v1796_v56  ;;  %v1208_v32 = vsel %vm719_vm9, %v1200_v33, %v1795_v27  ;;  %v1869_v34 = vpop.permute.xlu1 %1868  ;;  %1471 = vmatprep.subr.bf16.mxu1 %v1988_v22 }
 0x2e9   : > { %v1216_v13 = vsel %vm737_vm11, %v1208_v32, %v1830_v41  ;;  %v1217_v36 = vsel %vm737_vm11, %v1209_v30, %v1831_v29  ;;  %v1871_v55 = vunpack.i.h.bf16 %v1869_v34  ;;  %v1870_v37 = vunpack.i.l.bf16 %v1869_v34  ;;  %v1874_v59 = vpop.permute.xlu0 %1873 }
 0x2ea   : > { %v1225_v42 = vsel %vm1218_vm14, %v1216_v13, %v1860_v28  ;;  %v1226_v38 = vsel %vm1218_vm14, %v1217_v36, %v1861_v15  ;;  %v1876_v63 = vunpack.i.h.bf16 %v1874_v59  ;;  %v1875_v39 = vunpack.i.l.bf16 %v1874_v59 }
 0x2eb   : > { %v1234_v40 = vsel %vm1227_vm15, %v1225_v42, %v1870_v37  ;;  %v1235_v44 = vsel %vm1227_vm15, %v1226_v38, %v1871_v55 }
 0x2ec   : > { %v1243_v22 = vsel %vm1236_vm0, %v1234_v40, %v1875_v39  ;;  %v1244_v7 = vsel %vm1236_vm0, %v1235_v44, %v1876_v63  ;;  %v1879_v47 = vpop.permute.xlu1 %1878 }
 0x2ed   : > { %v1881_v48 = vunpack.i.h.bf16 %v1879_v47  ;;  %v1880_v0 = vunpack.i.l.bf16 %v1879_v47 }
 0x2ef   : > { %v1252_v3 = vsel %vm1245_vm1, %v1243_v22, %v1880_v0  ;;  %v1253_v54 = vsel %vm1245_vm1, %v1244_v7, %v1881_v48 }
 0x2f0   : > { %v1257_v58 = vpack.c.bf16 %v1253_v54, %v1252_v3 }
 0x2f2   : > { %v1273_v62 = vsel %vm1259_vm2, %v1257_v58, 0 }
 0x2f3   : > { %1472 = vmatpush3.bf16.xpose.msra.mxu1 %v1273_v62 }
 0x2fa   : > { %1474 = vmatmul.mubr.msk.bf16.vlgmr.msra.gmra.mrb[0].mxu1 %vm1259_vm2, %v1258_v45  ;;  %v1319_v35 = vpop.permute.xlu0 %1318 }
 0x2fd   : > { %v1326_v5 = vpop.permute.xlu1 %1325 }
 0x3cd   : > { %v1309_v2 = vpop.f32.mrb[0].mxu1 }
 0x3ce   : > { %v1321_v6 = vmul.f32 %v1319_v35, %v1309_v2  ;;  %v1475_v8 = vpop.f32.mrb[1].mxu1 }
 0x3cf   : > { %v1312_v50 = vpop.f32.mrb[2].mxu1 }
 0x3d0   : > { %v1328_v52 = vadd.f32 %v1326_v5, %v1321_v6  ;;  %v1476_v9 = vpop.f32.mrb[3].mxu1 }
 0x3d2   : > { %v1329_v10 = vmax.f32 %v1328_v52, 0.0 }
 0x3d4   : > { %1330 = vst.msk [vmem:[%s296_s8] sm:$0xff] %vm1245_vm1, %v1329_v10 }
 0x3d5   : > { %1930 = shalt.err (!%p1927_p2)
}
 0x3d6   : > { %s1931_s16 = scalar_lea.hbm %s2690_s15, 128  ;;  %s1935_s19 = scalar_lea.hbm %s2742_s7, 256 }
 0x3d7   : > { %p1932_p4 = scmp.ne.s32.totalorder %s2690_s15, %s1931_s16  ;;  %p1936_p9 = scmp.lt.u32.totalorder %s2690_s15, %s2742_s7 }
 0x3d8   : > { %p1937_p1 = scmp.lt.u32.totalorder %s1935_s19, %s1931_s16  ;;  %p1939_p6 = scmp.lt.u32.totalorder %s1931_s16, %s2690_s15 }
 0x3d9   : > { %p1933_p5 = pnand %p1932_p4, %p2749_p11 }
 0x3da   : > { %p1938_p3 = por %p1937_p1, %p1936_p9 }
 0x3db   : > { %p1934_p7 = pneg %p1933_p5 }
 0x3dc   : > { %p1940_p12 = por %p1939_p6, %p1938_p3 }
 0x3de   : > { %p1941_p13 = pnand %p1940_p12, %p1934_p7 }
 0x3e0   : > { %1944 = shalt.err (!%p1941_p13)
}
 0x3e1   : > { %1480 = dma.vmem_to_hbm [thread:$0]  (%p2749_p11), %s2692_s11, 128, %s2690_s15, %s1332_s22  }
 0x3e2 PF: > { %s1357_s17 = sand.u32 1, %s1971_s24   ;;  %p2750_p8 = scmp.ne.s32.totalorder %s2747_s14, 0 }
 0x3e3   : > { %p2751_p10 = scmp.ge.s32.totalorder %s1983_s27, 2  ;;  %s1358_s18 = scalar_lea.sflag [#allocation4], %s1357_s17 }
 0x3e5   : > { %p1487_p0 = pnand %p2751_p10, %p2750_p8 }
 0x3e7   : > { %1966 = dma.done.wait (!%p1487_p0), %s1358_s18, 128  }
 0x3e8   : > { %1968 = vsyncadd (!%p1487_p0), %s1358_s18, 4294967168  ;;  %p20_p2 = scmp.ge.s32.totalorder %s2070_s30, 4   ;;  %s2752_s24 = smov %s1975_s25 }
 0x3e9   : > { %s2753_s25 = smov %s1979_s26  ;;  %s2754_s26 = smov %s2082_s10 }
 0x3ea   : > { %s2755_s27 = smov %s2070_s30  ;;  %22 = sbr.rel (!%p20_p2) target bundleno = 5 (0x5), region = 93 }
 0x3f1   :  { %1363 = vsyncpa [#allocation3], 1 }
 0x3f2   :  { %1365 = vsyncpa [#allocation3 + $0x1], 1 }
 0x3f3   :  { %1366 = vsyncpa [#allocation4], 1 }
 0x3f4   :  { %1368 = vsyncpa [#allocation4 + $0x1], 1 }

</bundles_post_ra>
